<compile_context>
chip_gen: v7x
topology: tpu7x:2x2x1
jax: 0.10.0
libtpu: 0.0.40
codegen_flags: <defaults>
</compile_context>

<pallas_src>
import functools

import jax
import jax.numpy as jnp
from jax.experimental import pallas as pl
from jax.experimental.pallas import tpu as pltpu


# ----------------------------- Pallas kernel -----------------------------------------
def make_encoder_kernel(num_layers: int, max_diffusion_step: int, batch_nodes: int,
                        rnn_units: int):
    """Kernel processing the WHOLE batch through all encoder layers in one grid step."""
    K = max_diffusion_step
    BN = batch_nodes          # B * num_nodes (batch folded into the row axis)
    U = rnn_units
    L = num_layers
    W_PER_LAYER = 9           # wx_r, wh_r, wx_u, wh_u, wx_c, wh_c, b_r, b_u, b_c

    def kernel(*refs):
        x_ref, h0_ref, adj_ref = refs[0], refs[1], refs[2]
        w_refs = refs[3:3 + W_PER_LAYER * L]
        out_ref, hid_ref = refs[3 + W_PER_LAYER * L:]

        adj = adj_ref[...]                            # (BN, BN) block-diagonal support

        def diffusion(feat):
            # Chebyshev-style recurrence: T0 = X, T1 = A X, Tk = 2 A T_{k-1} - T_{k-2}.
            ts = [feat]
            if K >= 1:
                t_prev = feat
                t_cur = jnp.dot(adj, feat, preferred_element_type=jnp.float32)
                ts.append(t_cur)
                for _ in range(2, K + 1):
                    t_next = (2.0 * jnp.dot(adj, t_cur,
                                            preferred_element_type=jnp.float32) - t_prev)
                    ts.append(t_next)
                    t_prev, t_cur = t_cur, t_next
            return ts

        def gconv(ts_a, w_a, ts_b, w_b, bias):
            # sum_k ts_a[k] @ w_a[k] + ts_b[k] @ w_b[k]  (+ broadcast bias).
            # Per-order small dots: every operand is vreg-aligned, no lane concat/slice.
            acc = jnp.dot(ts_a[0], w_a[0], preferred_element_type=jnp.float32)
            acc = acc + jnp.dot(ts_b[0], w_b[0], preferred_element_type=jnp.float32)
            for k in range(1, K + 1):
                acc = acc + jnp.dot(ts_a[k], w_a[k], preferred_element_type=jnp.float32)
                acc = acc + jnp.dot(ts_b[k], w_b[k], preferred_element_type=jnp.float32)
            return acc + bias                          # bias: (1, U) broadcast add (VPU)

        feat = x_ref[...].astype(jnp.float32)          # (BN, fin0)
        for layer in range(L):
            wl = w_refs[W_PER_LAYER * layer: W_PER_LAYER * (layer + 1)]
            wx_r, wh_r, wx_u, wh_u, wx_c, wh_c = wl[0], wl[1], wl[2], wl[3], wl[4], wl[5]
            b_r = wl[6][...]                           # (1, U)
            b_u = wl[7][...]                           # (1, U)
            b_c = wl[8][...]                           # (1, U)

            h = h0_ref[layer]                          # (BN, U) leading-dim slice, no relayout

            t_x = diffusion(feat)                      # (K+1) x (BN, fin)
            t_h = diffusion(h)                         # (K+1) x (BN, U)

            r = jax.nn.sigmoid(gconv(t_x, wx_r, t_h, wh_r, b_r))    # (BN, U)
            u = jax.nn.sigmoid(gconv(t_x, wx_u, t_h, wh_u, b_u))    # (BN, U)

            t_rh = diffusion(r * h)                    # (K+1) x (BN, U)
            c = jnp.tanh(gconv(t_x, wx_c, t_rh, wh_c, b_c))         # (BN, U)

            h_new = u * h + (1.0 - u) * c              # (BN, U)
            hid_ref[layer] = h_new.astype(hid_ref.dtype)   # leading-dim store, no relayout
            feat = h_new                               # input to next layer

        out_ref[...] = feat.astype(out_ref.dtype)      # (BN, U)

    return kernel


# ----------------------------- Parameter init ----------------------------------------
def init_encoder_params(key, *, num_rnn_layers, input_dim, rnn_units, max_diffusion_step):
    """Per layer: (wx_r, wh_r, wx_u, wh_u, wx_c, wh_c, b_r, b_u, b_c).

    wx_*: (K+1, fin, U), wh_*: (K+1, U, U), biases: (1, U).
    Gate biases follow DCGRU bias_start = 1.0; candidate bias = 0.0.
    """
    K = max_diffusion_step
    U = rnn_units
    params = []
    for layer in range(num_rnn_layers):
        fin = input_dim if layer == 0 else U
        key, *ks = jax.random.split(key, 7)
        scale = 1.0 / jnp.sqrt(float((K + 1) * (fin + U)))
        wx_r = scale * jax.random.normal(ks[0], (K + 1, fin, U), jnp.float32)
        wh_r = scale * jax.random.normal(ks[1], (K + 1, U, U), jnp.float32)
        wx_u = scale * jax.random.normal(ks[2], (K + 1, fin, U), jnp.float32)
        wh_u = scale * jax.random.normal(ks[3], (K + 1, U, U), jnp.float32)
        wx_c = scale * jax.random.normal(ks[4], (K + 1, fin, U), jnp.float32)
        wh_c = scale * jax.random.normal(ks[5], (K + 1, U, U), jnp.float32)
        b_r = jnp.full((1, U), 1.0, jnp.float32)
        b_u = jnp.full((1, U), 1.0, jnp.float32)
        b_c = jnp.zeros((1, U), jnp.float32)
        params.append((wx_r, wh_r, wx_u, wh_u, wx_c, wh_c, b_r, b_u, b_c))
    return params


# ----------------------------- Encoder forward ---------------------------------------
def encoder_forward(inputs, adj, params, *, num_nodes, input_dim, rnn_units,
                    num_rnn_layers, max_diffusion_step, hidden_state=None):
    """inputs: (B, num_nodes * input_dim), adj: (num_nodes, num_nodes)
    returns (output (B, num_nodes*rnn_units), hidden (L, B, num_nodes*rnn_units))."""
    B = inputs.shape[0]
    N, U, L, K = num_nodes, rnn_units, num_rnn_layers, max_diffusion_step
    H = N * U
    BN = B * N
    if hidden_state is None:
        hidden_state = jnp.zeros((L, B, H), jnp.float32)

    # Free (contiguous) XLA-side relayouts: fold batch into the row axis.
    x = inputs.reshape(BN, input_dim)                          # (BN, Fin)
    h0 = hidden_state.reshape(L, BN, U)                        # (L, BN, U)
    adj_bd = jnp.kron(jnp.eye(B, dtype=adj.dtype), adj)        # (BN, BN) block-diag support

    kernel = make_encoder_kernel(L, K, BN, U)

    def full_spec(shape):
        zeros = (0,) * len(shape)
        return pl.BlockSpec(shape, lambda i, _z=zeros: _z)

    in_specs = [full_spec(x.shape), full_spec(h0.shape), full_spec(adj_bd.shape)]
    w_flat = []
    for layer_params in params:
        for w in layer_params:
            w_flat.append(w)
            in_specs.append(full_spec(w.shape))

    out, hid = pl.pallas_call(
        kernel,
        out_shape=(jax.ShapeDtypeStruct((BN, U), jnp.float32),
                   jax.ShapeDtypeStruct((L, BN, U), jnp.float32)),
        grid=(1,),                                              # whole batch in one step
        in_specs=in_specs,
        out_specs=[full_spec((BN, U)), full_spec((L, BN, U))],
        compiler_params=pltpu.CompilerParams(dimension_semantics=("arbitrary",)),
    )(x, h0, adj_bd, *w_flat)

    output = out.reshape(B, H)                                  # contiguous, free
    hidden = hid.reshape(L, B, H)                               # contiguous, free
    return output, hidden


# ----------------------------- Pure-JAX reference (for sanity) -----------------------
def encoder_forward_ref(inputs, adj, params, *, num_nodes, input_dim, rnn_units,
                        num_rnn_layers, max_diffusion_step, hidden_state=None):
    B = inputs.shape[0]
    N, U, L, K = num_nodes, rnn_units, num_rnn_layers, max_diffusion_step
    if hidden_state is None:
        hidden_state = jnp.zeros((L, B, N * U), jnp.float32)

    def diffusion(feat):
        ts = [feat]
        if K >= 1:
            t0 = feat
            t1 = jnp.einsum('nm,bmf->bnf', adj, feat)
            ts.append(t1)
            for _ in range(2, K + 1):
                t2 = 2.0 * jnp.einsum('nm,bmf->bnf', adj, t1) - t0
                ts.append(t2)
                t0, t1 = t1, t2
        return ts

    def gconv(ts_a, w_a, ts_b, w_b, bias):
        acc = bias
        for k in range(K + 1):
            acc = acc + jnp.einsum('bnf,fo->bno', ts_a[k], w_a[k])
            acc = acc + jnp.einsum('bnf,fo->bno', ts_b[k], w_b[k])
        return acc

    hs = []
    output = inputs
    for layer in range(L):
        fin = input_dim if layer == 0 else U
        x = output.reshape(B, N, fin)
        h = hidden_state[layer].reshape(B, N, U)
        wx_r, wh_r, wx_u, wh_u, wx_c, wh_c, b_r, b_u, b_c = params[layer]
        t_x = diffusion(x)
        t_h = diffusion(h)
        r = jax.nn.sigmoid(gconv(t_x, wx_r, t_h, wh_r, b_r))
        u = jax.nn.sigmoid(gconv(t_x, wx_u, t_h, wh_u, b_u))
        t_rh = diffusion(r * h)
        c = jnp.tanh(gconv(t_x, wx_c, t_rh, wh_c, b_c))
        h_new = u * h + (1.0 - u) * c
        flat = h_new.reshape(B, N * U)
        hs.append(flat)
        output = flat
    return output, jnp.stack(hs)


# --------------------------------- Main -----------------------------------------------
if __name__ == "__main__":
    # Small config consistent with Seq2SeqAttrs / EncoderModel.
    batch_size = 2
    num_nodes = 8
    input_dim = 2
    rnn_units = 16            # hidden_state_size = num_nodes * rnn_units = 128
    num_rnn_layers = 2
    max_diffusion_step = 2

    key = jax.random.PRNGKey(0)
    k_in, k_adj, k_param, k_h = jax.random.split(key, 4)

    inputs = jax.random.normal(k_in, (batch_size, num_nodes * input_dim), jnp.float32)
    adj_raw = jax.random.uniform(k_adj, (num_nodes, num_nodes), jnp.float32)
    adj = adj_raw / jnp.sum(adj_raw, axis=1, keepdims=True)     # row-normalized support

    params = init_encoder_params(
        k_param, num_rnn_layers=num_rnn_layers, input_dim=input_dim,
        rnn_units=rnn_units, max_diffusion_step=max_diffusion_step)

    run = functools.partial(
        encoder_forward, num_nodes=num_nodes, input_dim=input_dim,
        rnn_units=rnn_units, num_rnn_layers=num_rnn_layers,
        max_diffusion_step=max_diffusion_step)
    run_ref = functools.partial(
        encoder_forward_ref, num_nodes=num_nodes, input_dim=input_dim,
        rnn_units=rnn_units, num_rnn_layers=num_rnn_layers,
        max_diffusion_step=max_diffusion_step)

    # --- default (zero) initial hidden state ---
    output, hidden = jax.jit(lambda x, a: run(x, a, params))(inputs, adj)
    jax.block_until_ready((output, hidden))
    ref_out, ref_hid = run_ref(inputs, adj, params)
    assert output.shape == (batch_size, num_nodes * rnn_units)
    assert hidden.shape == (num_rnn_layers, batch_size, num_nodes * rnn_units)
    assert jnp.allclose(output, ref_out, atol=1e-4, rtol=1e-4)
    assert jnp.allclose(hidden, ref_hid, atol=1e-4, rtol=1e-4)

    # --- non-zero initial hidden state ---
    h_init = 0.1 * jax.random.normal(
        k_h, (num_rnn_layers, batch_size, num_nodes * rnn_units), jnp.float32)
    out2, hid2 = jax.jit(lambda x, a, h: run(x, a, params, hidden_state=h))(
        inputs, adj, h_init)
    jax.block_until_ready((out2, hid2))
    ref_out2, ref_hid2 = run_ref(inputs, adj, params, hidden_state=h_init)
    assert jnp.allclose(out2, ref_out2, atol=1e-4, rtol=1e-4)
    assert jnp.allclose(hid2, ref_hid2, atol=1e-4, rtol=1e-4)

    print("KERNEL_OK")
</pallas_src>

<mosaic_0001>
module attributes {stable_mosaic.version = 11 : i64} {
  func.func @kernel(%arg0: i32, %arg1: memref<16x2xf32, #tpu.memory_space<vmem>>, %arg2: memref<2x16x16xf32, #tpu.memory_space<vmem>>, %arg3: memref<16x16xf32, #tpu.memory_space<vmem>>, %arg4: memref<3x2x16xf32, #tpu.memory_space<vmem>>, %arg5: memref<3x16x16xf32, #tpu.memory_space<vmem>>, %arg6: memref<3x2x16xf32, #tpu.memory_space<vmem>>, %arg7: memref<3x16x16xf32, #tpu.memory_space<vmem>>, %arg8: memref<3x2x16xf32, #tpu.memory_space<vmem>>, %arg9: memref<3x16x16xf32, #tpu.memory_space<vmem>>, %arg10: memref<1x16xf32, #tpu.memory_space<vmem>>, %arg11: memref<1x16xf32, #tpu.memory_space<vmem>>, %arg12: memref<1x16xf32, #tpu.memory_space<vmem>>, %arg13: memref<3x16x16xf32, #tpu.memory_space<vmem>>, %arg14: memref<3x16x16xf32, #tpu.memory_space<vmem>>, %arg15: memref<3x16x16xf32, #tpu.memory_space<vmem>>, %arg16: memref<3x16x16xf32, #tpu.memory_space<vmem>>, %arg17: memref<3x16x16xf32, #tpu.memory_space<vmem>>, %arg18: memref<3x16x16xf32, #tpu.memory_space<vmem>>, %arg19: memref<1x16xf32, #tpu.memory_space<vmem>>, %arg20: memref<1x16xf32, #tpu.memory_space<vmem>>, %arg21: memref<1x16xf32, #tpu.memory_space<vmem>>, %arg22: memref<16x16xf32, #tpu.memory_space<vmem>>, %arg23: memref<2x16x16xf32, #tpu.memory_space<vmem>>) attributes {dimension_semantics = [#tpu.dimension_semantics<arbitrary>], iteration_bounds = array<i64: 1>, scalar_prefetch = 0 : i64, scratch_operands = 0 : i64, tpu.core_type = #tpu.core_type<tc>, window_params = [{pipeline_mode = #tpu.pipeline_mode<synchronous>, transform_indices = @transform_0, window_bounds = array<i64: 16, 2>}, {pipeline_mode = #tpu.pipeline_mode<synchronous>, transform_indices = @transform_1, window_bounds = array<i64: 2, 16, 16>}, {pipeline_mode = #tpu.pipeline_mode<synchronous>, transform_indices = @transform_2, window_bounds = array<i64: 16, 16>}, {pipeline_mode = #tpu.pipeline_mode<synchronous>, transform_indices = @transform_3, window_bounds = array<i64: 3, 2, 16>}, {pipeline_mode = #tpu.pipeline_mode<synchronous>, transform_indices = @transform_4, window_bounds = array<i64: 3, 16, 16>}, {pipeline_mode = #tpu.pipeline_mode<synchronous>, transform_indices = @transform_5, window_bounds = array<i64: 3, 2, 16>}, {pipeline_mode = #tpu.pipeline_mode<synchronous>, transform_indices = @transform_6, window_bounds = array<i64: 3, 16, 16>}, {pipeline_mode = #tpu.pipeline_mode<synchronous>, transform_indices = @transform_7, window_bounds = array<i64: 3, 2, 16>}, {pipeline_mode = #tpu.pipeline_mode<synchronous>, transform_indices = @transform_8, window_bounds = array<i64: 3, 16, 16>}, {pipeline_mode = #tpu.pipeline_mode<synchronous>, transform_indices = @transform_9, window_bounds = array<i64: 1, 16>}, {pipeline_mode = #tpu.pipeline_mode<synchronous>, transform_indices = @transform_10, window_bounds = array<i64: 1, 16>}, {pipeline_mode = #tpu.pipeline_mode<synchronous>, transform_indices = @transform_11, window_bounds = array<i64: 1, 16>}, {pipeline_mode = #tpu.pipeline_mode<synchronous>, transform_indices = @transform_12, window_bounds = array<i64: 3, 16, 16>}, {pipeline_mode = #tpu.pipeline_mode<synchronous>, transform_indices = @transform_13, window_bounds = array<i64: 3, 16, 16>}, {pipeline_mode = #tpu.pipeline_mode<synchronous>, transform_indices = @transform_14, window_bounds = array<i64: 3, 16, 16>}, {pipeline_mode = #tpu.pipeline_mode<synchronous>, transform_indices = @transform_15, window_bounds = array<i64: 3, 16, 16>}, {pipeline_mode = #tpu.pipeline_mode<synchronous>, transform_indices = @transform_16, window_bounds = array<i64: 3, 16, 16>}, {pipeline_mode = #tpu.pipeline_mode<synchronous>, transform_indices = @transform_17, window_bounds = array<i64: 3, 16, 16>}, {pipeline_mode = #tpu.pipeline_mode<synchronous>, transform_indices = @transform_18, window_bounds = array<i64: 1, 16>}, {pipeline_mode = #tpu.pipeline_mode<synchronous>, transform_indices = @transform_19, window_bounds = array<i64: 1, 16>}, {pipeline_mode = #tpu.pipeline_mode<synchronous>, transform_indices = @transform_20, window_bounds = array<i64: 1, 16>}, {pipeline_mode = #tpu.pipeline_mode<synchronous>, transform_indices = @transform_21, window_bounds = array<i64: 16, 16>}, {pipeline_mode = #tpu.pipeline_mode<synchronous>, transform_indices = @transform_22, window_bounds = array<i64: 2, 16, 16>}]} {
    %c0 = arith.constant 0 : index
    %c0_0 = arith.constant 0 : index
    %0 = vector.load %arg3[%c0, %c0_0] : memref<16x16xf32, #tpu.memory_space<vmem>>, vector<16x16xf32>
    %c0_1 = arith.constant 0 : index
    %c0_2 = arith.constant 0 : index
    %1 = vector.load %arg1[%c0_1, %c0_2] : memref<16x2xf32, #tpu.memory_space<vmem>>, vector<16x2xf32>
    %c0_3 = arith.constant 0 : index
    %c0_4 = arith.constant 0 : index
    %2 = vector.load %arg10[%c0_3, %c0_4] : memref<1x16xf32, #tpu.memory_space<vmem>>, vector<1x16xf32>
    %c0_5 = arith.constant 0 : index
    %c0_6 = arith.constant 0 : index
    %3 = vector.load %arg11[%c0_5, %c0_6] : memref<1x16xf32, #tpu.memory_space<vmem>>, vector<1x16xf32>
    %c0_7 = arith.constant 0 : index
    %c0_8 = arith.constant 0 : index
    %4 = vector.load %arg12[%c0_7, %c0_8] : memref<1x16xf32, #tpu.memory_space<vmem>>, vector<1x16xf32>
    %c0_9 = arith.constant 0 : index
    %c0_10 = arith.constant 0 : index
    %c0_11 = arith.constant 0 : index
    %5 = vector.load %arg2[%c0_9, %c0_10, %c0_11] : memref<2x16x16xf32, #tpu.memory_space<vmem>>, vector<1x16x16xf32>
    %6 = vector.shape_cast %5 : vector<1x16x16xf32> to vector<16x16xf32>
    %cst = arith.constant dense<0.000000e+00> : vector<16x2xf32>
    %7 = tpu.matmul %0, %1, %cst {dimension_numbers = #tpu.dot_dimension_numbers<[1], [0], [0], [1], [0, 0, 1, 1], [], []>} : vector<16x16xf32>, vector<16x2xf32>, vector<16x2xf32> -> vector<16x2xf32>
    %cst_12 = arith.constant dense<0.000000e+00> : vector<16x2xf32>
    %8 = tpu.matmul %0, %7, %cst_12 {dimension_numbers = #tpu.dot_dimension_numbers<[1], [0], [0], [1], [0, 0, 1, 1], [], []>} : vector<16x16xf32>, vector<16x2xf32>, vector<16x2xf32> -> vector<16x2xf32>
    %cst_13 = arith.constant 2.000000e+00 : f32
    %9 = vector.broadcast %cst_13 : f32 to vector<16x2xf32>
    %10 = arith.mulf %9, %8 : vector<16x2xf32>
    %11 = arith.subf %10, %1 : vector<16x2xf32>
    %cst_14 = arith.constant dense<0.000000e+00> : vector<16x16xf32>
    %12 = tpu.matmul %0, %6, %cst_14 {dimension_numbers = #tpu.dot_dimension_numbers<[1], [0], [0], [1], [0, 0, 1, 1], [], []>} : vector<16x16xf32>, vector<16x16xf32>, vector<16x16xf32> -> vector<16x16xf32>
    %cst_15 = arith.constant dense<0.000000e+00> : vector<16x16xf32>
    %13 = tpu.matmul %0, %12, %cst_15 {dimension_numbers = #tpu.dot_dimension_numbers<[1], [0], [0], [1], [0, 0, 1, 1], [], []>} : vector<16x16xf32>, vector<16x16xf32>, vector<16x16xf32> -> vector<16x16xf32>
    %cst_16 = arith.constant 2.000000e+00 : f32
    %14 = vector.broadcast %cst_16 : f32 to vector<16x16xf32>
    %15 = arith.mulf %14, %13 : vector<16x16xf32>
    %16 = arith.subf %15, %6 : vector<16x16xf32>
    %c0_17 = arith.constant 0 : index
    %c0_18 = arith.constant 0 : index
    %c0_19 = arith.constant 0 : index
    %17 = vector.load %arg4[%c0_17, %c0_18, %c0_19] : memref<3x2x16xf32, #tpu.memory_space<vmem>>, vector<1x2x16xf32>
    %18 = vector.shape_cast %17 : vector<1x2x16xf32> to vector<2x16xf32>
    %cst_20 = arith.constant dense<0.000000e+00> : vector<16x16xf32>
    %19 = tpu.matmul %1, %18, %cst_20 {dimension_numbers = #tpu.dot_dimension_numbers<[1], [0], [0], [1], [0, 0, 1, 1], [], []>} : vector<16x2xf32>, vector<2x16xf32>, vector<16x16xf32> -> vector<16x16xf32>
    %c0_21 = arith.constant 0 : index
    %c0_22 = arith.constant 0 : index
    %c0_23 = arith.constant 0 : index
    %20 = vector.load %arg5[%c0_21, %c0_22, %c0_23] : memref<3x16x16xf32, #tpu.memory_space<vmem>>, vector<1x16x16xf32>
    %21 = vector.shape_cast %20 : vector<1x16x16xf32> to vector<16x16xf32>
    %cst_24 = arith.constant dense<0.000000e+00> : vector<16x16xf32>
    %22 = tpu.matmul %6, %21, %cst_24 {dimension_numbers = #tpu.dot_dimension_numbers<[1], [0], [0], [1], [0, 0, 1, 1], [], []>} : vector<16x16xf32>, vector<16x16xf32>, vector<16x16xf32> -> vector<16x16xf32>
    %23 = arith.addf %19, %22 : vector<16x16xf32>
    %c1 = arith.constant 1 : index
    %c0_25 = arith.constant 0 : index
    %c0_26 = arith.constant 0 : index
    %24 = vector.load %arg4[%c1, %c0_25, %c0_26] : memref<3x2x16xf32, #tpu.memory_space<vmem>>, vector<1x2x16xf32>
    %25 = vector.shape_cast %24 : vector<1x2x16xf32> to vector<2x16xf32>
    %cst_27 = arith.constant dense<0.000000e+00> : vector<16x16xf32>
    %26 = tpu.matmul %7, %25, %cst_27 {dimension_numbers = #tpu.dot_dimension_numbers<[1], [0], [0], [1], [0, 0, 1, 1], [], []>} : vector<16x2xf32>, vector<2x16xf32>, vector<16x16xf32> -> vector<16x16xf32>
    %27 = arith.addf %23, %26 : vector<16x16xf32>
    %c1_28 = arith.constant 1 : index
    %c0_29 = arith.constant 0 : index
    %c0_30 = arith.constant 0 : index
    %28 = vector.load %arg5[%c1_28, %c0_29, %c0_30] : memref<3x16x16xf32, #tpu.memory_space<vmem>>, vector<1x16x16xf32>
    %29 = vector.shape_cast %28 : vector<1x16x16xf32> to vector<16x16xf32>
    %cst_31 = arith.constant dense<0.000000e+00> : vector<16x16xf32>
    %30 = tpu.matmul %12, %29, %cst_31 {dimension_numbers = #tpu.dot_dimension_numbers<[1], [0], [0], [1], [0, 0, 1, 1], [], []>} : vector<16x16xf32>, vector<16x16xf32>, vector<16x16xf32> -> vector<16x16xf32>
    %31 = arith.addf %27, %30 : vector<16x16xf32>
    %c2 = arith.constant 2 : index
    %c0_32 = arith.constant 0 : index
    %c0_33 = arith.constant 0 : index
    %32 = vector.load %arg4[%c2, %c0_32, %c0_33] : memref<3x2x16xf32, #tpu.memory_space<vmem>>, vector<1x2x16xf32>
    %33 = vector.shape_cast %32 : vector<1x2x16xf32> to vector<2x16xf32>
    %cst_34 = arith.constant dense<0.000000e+00> : vector<16x16xf32>
    %34 = tpu.matmul %11, %33, %cst_34 {dimension_numbers = #tpu.dot_dimension_numbers<[1], [0], [0], [1], [0, 0, 1, 1], [], []>} : vector<16x2xf32>, vector<2x16xf32>, vector<16x16xf32> -> vector<16x16xf32>
    %35 = arith.addf %31, %34 : vector<16x16xf32>
    %c2_35 = arith.constant 2 : index
    %c0_36 = arith.constant 0 : index
    %c0_37 = arith.constant 0 : index
    %36 = vector.load %arg5[%c2_35, %c0_36, %c0_37] : memref<3x16x16xf32, #tpu.memory_space<vmem>>, vector<1x16x16xf32>
    %37 = vector.shape_cast %36 : vector<1x16x16xf32> to vector<16x16xf32>
    %cst_38 = arith.constant dense<0.000000e+00> : vector<16x16xf32>
    %38 = tpu.matmul %16, %37, %cst_38 {dimension_numbers = #tpu.dot_dimension_numbers<[1], [0], [0], [1], [0, 0, 1, 1], [], []>} : vector<16x16xf32>, vector<16x16xf32>, vector<16x16xf32> -> vector<16x16xf32>
    %39 = arith.addf %35, %38 : vector<16x16xf32>
    %40 = vector.broadcast %2 : vector<1x16xf32> to vector<16x16xf32>
    %41 = arith.addf %39, %40 : vector<16x16xf32>
    %42 = arith.negf %41 : vector<16x16xf32>
    %43 = math.exp %42 : vector<16x16xf32>
    %cst_39 = arith.constant 1.000000e+00 : f32
    %44 = vector.broadcast %cst_39 : f32 to vector<16x16xf32>
    %45 = arith.addf %44, %43 : vector<16x16xf32>
    %46 = arith.divf %44, %45 : vector<16x16xf32>
    %c0_40 = arith.constant 0 : index
    %c0_41 = arith.constant 0 : index
    %c0_42 = arith.constant 0 : index
    %47 = vector.load %arg6[%c0_40, %c0_41, %c0_42] : memref<3x2x16xf32, #tpu.memory_space<vmem>>, vector<1x2x16xf32>
    %48 = vector.shape_cast %47 : vector<1x2x16xf32> to vector<2x16xf32>
    %cst_43 = arith.constant dense<0.000000e+00> : vector<16x16xf32>
    %49 = tpu.matmul %1, %48, %cst_43 {dimension_numbers = #tpu.dot_dimension_numbers<[1], [0], [0], [1], [0, 0, 1, 1], [], []>} : vector<16x2xf32>, vector<2x16xf32>, vector<16x16xf32> -> vector<16x16xf32>
    %c0_44 = arith.constant 0 : index
    %c0_45 = arith.constant 0 : index
    %c0_46 = arith.constant 0 : index
    %50 = vector.load %arg7[%c0_44, %c0_45, %c0_46] : memref<3x16x16xf32, #tpu.memory_space<vmem>>, vector<1x16x16xf32>
    %51 = vector.shape_cast %50 : vector<1x16x16xf32> to vector<16x16xf32>
    %cst_47 = arith.constant dense<0.000000e+00> : vector<16x16xf32>
    %52 = tpu.matmul %6, %51, %cst_47 {dimension_numbers = #tpu.dot_dimension_numbers<[1], [0], [0], [1], [0, 0, 1, 1], [], []>} : vector<16x16xf32>, vector<16x16xf32>, vector<16x16xf32> -> vector<16x16xf32>
    %53 = arith.addf %49, %52 : vector<16x16xf32>
    %c1_48 = arith.constant 1 : index
    %c0_49 = arith.constant 0 : index
    %c0_50 = arith.constant 0 : index
    %54 = vector.load %arg6[%c1_48, %c0_49, %c0_50] : memref<3x2x16xf32, #tpu.memory_space<vmem>>, vector<1x2x16xf32>
    %55 = vector.shape_cast %54 : vector<1x2x16xf32> to vector<2x16xf32>
    %cst_51 = arith.constant dense<0.000000e+00> : vector<16x16xf32>
    %56 = tpu.matmul %7, %55, %cst_51 {dimension_numbers = #tpu.dot_dimension_numbers<[1], [0], [0], [1], [0, 0, 1, 1], [], []>} : vector<16x2xf32>, vector<2x16xf32>, vector<16x16xf32> -> vector<16x16xf32>
    %57 = arith.addf %53, %56 : vector<16x16xf32>
    %c1_52 = arith.constant 1 : index
    %c0_53 = arith.constant 0 : index
    %c0_54 = arith.constant 0 : index
    %58 = vector.load %arg7[%c1_52, %c0_53, %c0_54] : memref<3x16x16xf32, #tpu.memory_space<vmem>>, vector<1x16x16xf32>
    %59 = vector.shape_cast %58 : vector<1x16x16xf32> to vector<16x16xf32>
    %cst_55 = arith.constant dense<0.000000e+00> : vector<16x16xf32>
    %60 = tpu.matmul %12, %59, %cst_55 {dimension_numbers = #tpu.dot_dimension_numbers<[1], [0], [0], [1], [0, 0, 1, 1], [], []>} : vector<16x16xf32>, vector<16x16xf32>, vector<16x16xf32> -> vector<16x16xf32>
    %61 = arith.addf %57, %60 : vector<16x16xf32>
    %c2_56 = arith.constant 2 : index
    %c0_57 = arith.constant 0 : index
    %c0_58 = arith.constant 0 : index
    %62 = vector.load %arg6[%c2_56, %c0_57, %c0_58] : memref<3x2x16xf32, #tpu.memory_space<vmem>>, vector<1x2x16xf32>
    %63 = vector.shape_cast %62 : vector<1x2x16xf32> to vector<2x16xf32>
    %cst_59 = arith.constant dense<0.000000e+00> : vector<16x16xf32>
    %64 = tpu.matmul %11, %63, %cst_59 {dimension_numbers = #tpu.dot_dimension_numbers<[1], [0], [0], [1], [0, 0, 1, 1], [], []>} : vector<16x2xf32>, vector<2x16xf32>, vector<16x16xf32> -> vector<16x16xf32>
    %65 = arith.addf %61, %64 : vector<16x16xf32>
    %c2_60 = arith.constant 2 : index
    %c0_61 = arith.constant 0 : index
    %c0_62 = arith.constant 0 : index
    %66 = vector.load %arg7[%c2_60, %c0_61, %c0_62] : memref<3x16x16xf32, #tpu.memory_space<vmem>>, vector<1x16x16xf32>
    %67 = vector.shape_cast %66 : vector<1x16x16xf32> to vector<16x16xf32>
    %cst_63 = arith.constant dense<0.000000e+00> : vector<16x16xf32>
    %68 = tpu.matmul %16, %67, %cst_63 {dimension_numbers = #tpu.dot_dimension_numbers<[1], [0], [0], [1], [0, 0, 1, 1], [], []>} : vector<16x16xf32>, vector<16x16xf32>, vector<16x16xf32> -> vector<16x16xf32>
    %69 = arith.addf %65, %68 : vector<16x16xf32>
    %70 = vector.broadcast %3 : vector<1x16xf32> to vector<16x16xf32>
    %71 = arith.addf %69, %70 : vector<16x16xf32>
    %72 = arith.negf %71 : vector<16x16xf32>
    %73 = math.exp %72 : vector<16x16xf32>
    %cst_64 = arith.constant 1.000000e+00 : f32
    %74 = vector.broadcast %cst_64 : f32 to vector<16x16xf32>
    %75 = arith.addf %74, %73 : vector<16x16xf32>
    %76 = arith.divf %74, %75 : vector<16x16xf32>
    %77 = arith.mulf %46, %6 : vector<16x16xf32>
    %cst_65 = arith.constant dense<0.000000e+00> : vector<16x16xf32>
    %78 = tpu.matmul %0, %77, %cst_65 {dimension_numbers = #tpu.dot_dimension_numbers<[1], [0], [0], [1], [0, 0, 1, 1], [], []>} : vector<16x16xf32>, vector<16x16xf32>, vector<16x16xf32> -> vector<16x16xf32>
    %cst_66 = arith.constant dense<0.000000e+00> : vector<16x16xf32>
    %79 = tpu.matmul %0, %78, %cst_66 {dimension_numbers = #tpu.dot_dimension_numbers<[1], [0], [0], [1], [0, 0, 1, 1], [], []>} : vector<16x16xf32>, vector<16x16xf32>, vector<16x16xf32> -> vector<16x16xf32>
    %cst_67 = arith.constant 2.000000e+00 : f32
    %80 = vector.broadcast %cst_67 : f32 to vector<16x16xf32>
    %81 = arith.mulf %80, %79 : vector<16x16xf32>
    %82 = arith.subf %81, %77 : vector<16x16xf32>
    %c0_68 = arith.constant 0 : index
    %c0_69 = arith.constant 0 : index
    %c0_70 = arith.constant 0 : index
    %83 = vector.load %arg8[%c0_68, %c0_69, %c0_70] : memref<3x2x16xf32, #tpu.memory_space<vmem>>, vector<1x2x16xf32>
    %84 = vector.shape_cast %83 : vector<1x2x16xf32> to vector<2x16xf32>
    %cst_71 = arith.constant dense<0.000000e+00> : vector<16x16xf32>
    %85 = tpu.matmul %1, %84, %cst_71 {dimension_numbers = #tpu.dot_dimension_numbers<[1], [0], [0], [1], [0, 0, 1, 1], [], []>} : vector<16x2xf32>, vector<2x16xf32>, vector<16x16xf32> -> vector<16x16xf32>
    %c0_72 = arith.constant 0 : index
    %c0_73 = arith.constant 0 : index
    %c0_74 = arith.constant 0 : index
    %86 = vector.load %arg9[%c0_72, %c0_73, %c0_74] : memref<3x16x16xf32, #tpu.memory_space<vmem>>, vector<1x16x16xf32>
    %87 = vector.shape_cast %86 : vector<1x16x16xf32> to vector<16x16xf32>
    %cst_75 = arith.constant dense<0.000000e+00> : vector<16x16xf32>
    %88 = tpu.matmul %77, %87, %cst_75 {dimension_numbers = #tpu.dot_dimension_numbers<[1], [0], [0], [1], [0, 0, 1, 1], [], []>} : vector<16x16xf32>, vector<16x16xf32>, vector<16x16xf32> -> vector<16x16xf32>
    %89 = arith.addf %85, %88 : vector<16x16xf32>
    %c1_76 = arith.constant 1 : index
    %c0_77 = arith.constant 0 : index
    %c0_78 = arith.constant 0 : index
    %90 = vector.load %arg8[%c1_76, %c0_77, %c0_78] : memref<3x2x16xf32, #tpu.memory_space<vmem>>, vector<1x2x16xf32>
    %91 = vector.shape_cast %90 : vector<1x2x16xf32> to vector<2x16xf32>
    %cst_79 = arith.constant dense<0.000000e+00> : vector<16x16xf32>
    %92 = tpu.matmul %7, %91, %cst_79 {dimension_numbers = #tpu.dot_dimension_numbers<[1], [0], [0], [1], [0, 0, 1, 1], [], []>} : vector<16x2xf32>, vector<2x16xf32>, vector<16x16xf32> -> vector<16x16xf32>
    %93 = arith.addf %89, %92 : vector<16x16xf32>
    %c1_80 = arith.constant 1 : index
    %c0_81 = arith.constant 0 : index
    %c0_82 = arith.constant 0 : index
    %94 = vector.load %arg9[%c1_80, %c0_81, %c0_82] : memref<3x16x16xf32, #tpu.memory_space<vmem>>, vector<1x16x16xf32>
    %95 = vector.shape_cast %94 : vector<1x16x16xf32> to vector<16x16xf32>
    %cst_83 = arith.constant dense<0.000000e+00> : vector<16x16xf32>
    %96 = tpu.matmul %78, %95, %cst_83 {dimension_numbers = #tpu.dot_dimension_numbers<[1], [0], [0], [1], [0, 0, 1, 1], [], []>} : vector<16x16xf32>, vector<16x16xf32>, vector<16x16xf32> -> vector<16x16xf32>
    %97 = arith.addf %93, %96 : vector<16x16xf32>
    %c2_84 = arith.constant 2 : index
    %c0_85 = arith.constant 0 : index
    %c0_86 = arith.constant 0 : index
    %98 = vector.load %arg8[%c2_84, %c0_85, %c0_86] : memref<3x2x16xf32, #tpu.memory_space<vmem>>, vector<1x2x16xf32>
    %99 = vector.shape_cast %98 : vector<1x2x16xf32> to vector<2x16xf32>
    %cst_87 = arith.constant dense<0.000000e+00> : vector<16x16xf32>
    %100 = tpu.matmul %11, %99, %cst_87 {dimension_numbers = #tpu.dot_dimension_numbers<[1], [0], [0], [1], [0, 0, 1, 1], [], []>} : vector<16x2xf32>, vector<2x16xf32>, vector<16x16xf32> -> vector<16x16xf32>
    %101 = arith.addf %97, %100 : vector<16x16xf32>
    %c2_88 = arith.constant 2 : index
    %c0_89 = arith.constant 0 : index
    %c0_90 = arith.constant 0 : index
    %102 = vector.load %arg9[%c2_88, %c0_89, %c0_90] : memref<3x16x16xf32, #tpu.memory_space<vmem>>, vector<1x16x16xf32>
    %103 = vector.shape_cast %102 : vector<1x16x16xf32> to vector<16x16xf32>
    %cst_91 = arith.constant dense<0.000000e+00> : vector<16x16xf32>
    %104 = tpu.matmul %82, %103, %cst_91 {dimension_numbers = #tpu.dot_dimension_numbers<[1], [0], [0], [1], [0, 0, 1, 1], [], []>} : vector<16x16xf32>, vector<16x16xf32>, vector<16x16xf32> -> vector<16x16xf32>
    %105 = arith.addf %101, %104 : vector<16x16xf32>
    %106 = vector.broadcast %4 : vector<1x16xf32> to vector<16x16xf32>
    %107 = arith.addf %105, %106 : vector<16x16xf32>
    %108 = math.tanh %107 : vector<16x16xf32>
    %109 = arith.mulf %76, %6 : vector<16x16xf32>
    %cst_92 = arith.constant 1.000000e+00 : f32
    %110 = vector.broadcast %cst_92 : f32 to vector<16x16xf32>
    %111 = arith.subf %110, %76 : vector<16x16xf32>
    %112 = arith.mulf %111, %108 : vector<16x16xf32>
    %113 = arith.addf %109, %112 : vector<16x16xf32>
    %c0_93 = arith.constant 0 : index
    %c0_94 = arith.constant 0 : index
    %c0_95 = arith.constant 0 : index
    %114 = vector.load %arg23[%c0_93, %c0_94, %c0_95] : memref<2x16x16xf32, #tpu.memory_space<vmem>>, vector<1x16x16xf32>
    %115 = vector.shape_cast %114 : vector<1x16x16xf32> to vector<16x16xf32>
    %116 = vector.shape_cast %113 : vector<16x16xf32> to vector<1x16x16xf32>
    tpu.vector_store %arg23[%c0_93, %c0_94, %c0_95], %116 {strides = array<i32>} : memref<2x16x16xf32, #tpu.memory_space<vmem>>, vector<1x16x16xf32>,
    %c0_96 = arith.constant 0 : index
    %c0_97 = arith.constant 0 : index
    %117 = vector.load %arg19[%c0_96, %c0_97] : memref<1x16xf32, #tpu.memory_space<vmem>>, vector<1x16xf32>
    %c0_98 = arith.constant 0 : index
    %c0_99 = arith.constant 0 : index
    %118 = vector.load %arg20[%c0_98, %c0_99] : memref<1x16xf32, #tpu.memory_space<vmem>>, vector<1x16xf32>
    %c0_100 = arith.constant 0 : index
    %c0_101 = arith.constant 0 : index
    %119 = vector.load %arg21[%c0_100, %c0_101] : memref<1x16xf32, #tpu.memory_space<vmem>>, vector<1x16xf32>
    %c1_102 = arith.constant 1 : index
    %c0_103 = arith.constant 0 : index
    %c0_104 = arith.constant 0 : index
    %120 = vector.load %arg2[%c1_102, %c0_103, %c0_104] : memref<2x16x16xf32, #tpu.memory_space<vmem>>, vector<1x16x16xf32>
    %121 = vector.shape_cast %120 : vector<1x16x16xf32> to vector<16x16xf32>
    %cst_105 = arith.constant dense<0.000000e+00> : vector<16x16xf32>
    %122 = tpu.matmul %0, %113, %cst_105 {dimension_numbers = #tpu.dot_dimension_numbers<[1], [0], [0], [1], [0, 0, 1, 1], [], []>} : vector<16x16xf32>, vector<16x16xf32>, vector<16x16xf32> -> vector<16x16xf32>
    %cst_106 = arith.constant dense<0.000000e+00> : vector<16x16xf32>
    %123 = tpu.matmul %0, %122, %cst_106 {dimension_numbers = #tpu.dot_dimension_numbers<[1], [0], [0], [1], [0, 0, 1, 1], [], []>} : vector<16x16xf32>, vector<16x16xf32>, vector<16x16xf32> -> vector<16x16xf32>
    %cst_107 = arith.constant 2.000000e+00 : f32
    %124 = vector.broadcast %cst_107 : f32 to vector<16x16xf32>
    %125 = arith.mulf %124, %123 : vector<16x16xf32>
    %126 = arith.subf %125, %113 : vector<16x16xf32>
    %cst_108 = arith.constant dense<0.000000e+00> : vector<16x16xf32>
    %127 = tpu.matmul %0, %121, %cst_108 {dimension_numbers = #tpu.dot_dimension_numbers<[1], [0], [0], [1], [0, 0, 1, 1], [], []>} : vector<16x16xf32>, vector<16x16xf32>, vector<16x16xf32> -> vector<16x16xf32>
    %cst_109 = arith.constant dense<0.000000e+00> : vector<16x16xf32>
    %128 = tpu.matmul %0, %127, %cst_109 {dimension_numbers = #tpu.dot_dimension_numbers<[1], [0], [0], [1], [0, 0, 1, 1], [], []>} : vector<16x16xf32>, vector<16x16xf32>, vector<16x16xf32> -> vector<16x16xf32>
    %cst_110 = arith.constant 2.000000e+00 : f32
    %129 = vector.broadcast %cst_110 : f32 to vector<16x16xf32>
    %130 = arith.mulf %129, %128 : vector<16x16xf32>
    %131 = arith.subf %130, %121 : vector<16x16xf32>
    %c0_111 = arith.constant 0 : index
    %c0_112 = arith.constant 0 : index
    %c0_113 = arith.constant 0 : index
    %132 = vector.load %arg13[%c0_111, %c0_112, %c0_113] : memref<3x16x16xf32, #tpu.memory_space<vmem>>, vector<1x16x16xf32>
    %133 = vector.shape_cast %132 : vector<1x16x16xf32> to vector<16x16xf32>
    %cst_114 = arith.constant dense<0.000000e+00> : vector<16x16xf32>
    %134 = tpu.matmul %113, %133, %cst_114 {dimension_numbers = #tpu.dot_dimension_numbers<[1], [0], [0], [1], [0, 0, 1, 1], [], []>} : vector<16x16xf32>, vector<16x16xf32>, vector<16x16xf32> -> vector<16x16xf32>
    %c0_115 = arith.constant 0 : index
    %c0_116 = arith.constant 0 : index
    %c0_117 = arith.constant 0 : index
    %135 = vector.load %arg14[%c0_115, %c0_116, %c0_117] : memref<3x16x16xf32, #tpu.memory_space<vmem>>, vector<1x16x16xf32>
    %136 = vector.shape_cast %135 : vector<1x16x16xf32> to vector<16x16xf32>
    %cst_118 = arith.constant dense<0.000000e+00> : vector<16x16xf32>
    %137 = tpu.matmul %121, %136, %cst_118 {dimension_numbers = #tpu.dot_dimension_numbers<[1], [0], [0], [1], [0, 0, 1, 1], [], []>} : vector<16x16xf32>, vector<16x16xf32>, vector<16x16xf32> -> vector<16x16xf32>
    %138 = arith.addf %134, %137 : vector<16x16xf32>
    %c1_119 = arith.constant 1 : index
    %c0_120 = arith.constant 0 : index
    %c0_121 = arith.constant 0 : index
    %139 = vector.load %arg13[%c1_119, %c0_120, %c0_121] : memref<3x16x16xf32, #tpu.memory_space<vmem>>, vector<1x16x16xf32>
    %140 = vector.shape_cast %139 : vector<1x16x16xf32> to vector<16x16xf32>
    %cst_122 = arith.constant dense<0.000000e+00> : vector<16x16xf32>
    %141 = tpu.matmul %122, %140, %cst_122 {dimension_numbers = #tpu.dot_dimension_numbers<[1], [0], [0], [1], [0, 0, 1, 1], [], []>} : vector<16x16xf32>, vector<16x16xf32>, vector<16x16xf32> -> vector<16x16xf32>
    %142 = arith.addf %138, %141 : vector<16x16xf32>
    %c1_123 = arith.constant 1 : index
    %c0_124 = arith.constant 0 : index
    %c0_125 = arith.constant 0 : index
    %143 = vector.load %arg14[%c1_123, %c0_124, %c0_125] : memref<3x16x16xf32, #tpu.memory_space<vmem>>, vector<1x16x16xf32>
    %144 = vector.shape_cast %143 : vector<1x16x16xf32> to vector<16x16xf32>
    %cst_126 = arith.constant dense<0.000000e+00> : vector<16x16xf32>
    %145 = tpu.matmul %127, %144, %cst_126 {dimension_numbers = #tpu.dot_dimension_numbers<[1], [0], [0], [1], [0, 0, 1, 1], [], []>} : vector<16x16xf32>, vector<16x16xf32>, vector<16x16xf32> -> vector<16x16xf32>
    %146 = arith.addf %142, %145 : vector<16x16xf32>
    %c2_127 = arith.constant 2 : index
    %c0_128 = arith.constant 0 : index
    %c0_129 = arith.constant 0 : index
    %147 = vector.load %arg13[%c2_127, %c0_128, %c0_129] : memref<3x16x16xf32, #tpu.memory_space<vmem>>, vector<1x16x16xf32>
    %148 = vector.shape_cast %147 : vector<1x16x16xf32> to vector<16x16xf32>
    %cst_130 = arith.constant dense<0.000000e+00> : vector<16x16xf32>
    %149 = tpu.matmul %126, %148, %cst_130 {dimension_numbers = #tpu.dot_dimension_numbers<[1], [0], [0], [1], [0, 0, 1, 1], [], []>} : vector<16x16xf32>, vector<16x16xf32>, vector<16x16xf32> -> vector<16x16xf32>
    %150 = arith.addf %146, %149 : vector<16x16xf32>
    %c2_131 = arith.constant 2 : index
    %c0_132 = arith.constant 0 : index
    %c0_133 = arith.constant 0 : index
    %151 = vector.load %arg14[%c2_131, %c0_132, %c0_133] : memref<3x16x16xf32, #tpu.memory_space<vmem>>, vector<1x16x16xf32>
    %152 = vector.shape_cast %151 : vector<1x16x16xf32> to vector<16x16xf32>
    %cst_134 = arith.constant dense<0.000000e+00> : vector<16x16xf32>
    %153 = tpu.matmul %131, %152, %cst_134 {dimension_numbers = #tpu.dot_dimension_numbers<[1], [0], [0], [1], [0, 0, 1, 1], [], []>} : vector<16x16xf32>, vector<16x16xf32>, vector<16x16xf32> -> vector<16x16xf32>
    %154 = arith.addf %150, %153 : vector<16x16xf32>
    %155 = vector.broadcast %117 : vector<1x16xf32> to vector<16x16xf32>
    %156 = arith.addf %154, %155 : vector<16x16xf32>
    %157 = arith.negf %156 : vector<16x16xf32>
    %158 = math.exp %157 : vector<16x16xf32>
    %cst_135 = arith.constant 1.000000e+00 : f32
    %159 = vector.broadcast %cst_135 : f32 to vector<16x16xf32>
    %160 = arith.addf %159, %158 : vector<16x16xf32>
    %161 = arith.divf %159, %160 : vector<16x16xf32>
    %c0_136 = arith.constant 0 : index
    %c0_137 = arith.constant 0 : index
    %c0_138 = arith.constant 0 : index
    %162 = vector.load %arg15[%c0_136, %c0_137, %c0_138] : memref<3x16x16xf32, #tpu.memory_space<vmem>>, vector<1x16x16xf32>
    %163 = vector.shape_cast %162 : vector<1x16x16xf32> to vector<16x16xf32>
    %cst_139 = arith.constant dense<0.000000e+00> : vector<16x16xf32>
    %164 = tpu.matmul %113, %163, %cst_139 {dimension_numbers = #tpu.dot_dimension_numbers<[1], [0], [0], [1], [0, 0, 1, 1], [], []>} : vector<16x16xf32>, vector<16x16xf32>, vector<16x16xf32> -> vector<16x16xf32>
    %c0_140 = arith.constant 0 : index
    %c0_141 = arith.constant 0 : index
    %c0_142 = arith.constant 0 : index
    %165 = vector.load %arg16[%c0_140, %c0_141, %c0_142] : memref<3x16x16xf32, #tpu.memory_space<vmem>>, vector<1x16x16xf32>
    %166 = vector.shape_cast %165 : vector<1x16x16xf32> to vector<16x16xf32>
    %cst_143 = arith.constant dense<0.000000e+00> : vector<16x16xf32>
    %167 = tpu.matmul %121, %166, %cst_143 {dimension_numbers = #tpu.dot_dimension_numbers<[1], [0], [0], [1], [0, 0, 1, 1], [], []>} : vector<16x16xf32>, vector<16x16xf32>, vector<16x16xf32> -> vector<16x16xf32>
    %168 = arith.addf %164, %167 : vector<16x16xf32>
    %c1_144 = arith.constant 1 : index
    %c0_145 = arith.constant 0 : index
    %c0_146 = arith.constant 0 : index
    %169 = vector.load %arg15[%c1_144, %c0_145, %c0_146] : memref<3x16x16xf32, #tpu.memory_space<vmem>>, vector<1x16x16xf32>
    %170 = vector.shape_cast %169 : vector<1x16x16xf32> to vector<16x16xf32>
    %cst_147 = arith.constant dense<0.000000e+00> : vector<16x16xf32>
    %171 = tpu.matmul %122, %170, %cst_147 {dimension_numbers = #tpu.dot_dimension_numbers<[1], [0], [0], [1], [0, 0, 1, 1], [], []>} : vector<16x16xf32>, vector<16x16xf32>, vector<16x16xf32> -> vector<16x16xf32>
    %172 = arith.addf %168, %171 : vector<16x16xf32>
    %c1_148 = arith.constant 1 : index
    %c0_149 = arith.constant 0 : index
    %c0_150 = arith.constant 0 : index
    %173 = vector.load %arg16[%c1_148, %c0_149, %c0_150] : memref<3x16x16xf32, #tpu.memory_space<vmem>>, vector<1x16x16xf32>
    %174 = vector.shape_cast %173 : vector<1x16x16xf32> to vector<16x16xf32>
    %cst_151 = arith.constant dense<0.000000e+00> : vector<16x16xf32>
    %175 = tpu.matmul %127, %174, %cst_151 {dimension_numbers = #tpu.dot_dimension_numbers<[1], [0], [0], [1], [0, 0, 1, 1], [], []>} : vector<16x16xf32>, vector<16x16xf32>, vector<16x16xf32> -> vector<16x16xf32>
    %176 = arith.addf %172, %175 : vector<16x16xf32>
    %c2_152 = arith.constant 2 : index
    %c0_153 = arith.constant 0 : index
    %c0_154 = arith.constant 0 : index
    %177 = vector.load %arg15[%c2_152, %c0_153, %c0_154] : memref<3x16x16xf32, #tpu.memory_space<vmem>>, vector<1x16x16xf32>
    %178 = vector.shape_cast %177 : vector<1x16x16xf32> to vector<16x16xf32>
    %cst_155 = arith.constant dense<0.000000e+00> : vector<16x16xf32>
    %179 = tpu.matmul %126, %178, %cst_155 {dimension_numbers = #tpu.dot_dimension_numbers<[1], [0], [0], [1], [0, 0, 1, 1], [], []>} : vector<16x16xf32>, vector<16x16xf32>, vector<16x16xf32> -> vector<16x16xf32>
    %180 = arith.addf %176, %179 : vector<16x16xf32>
    %c2_156 = arith.constant 2 : index
    %c0_157 = arith.constant 0 : index
    %c0_158 = arith.constant 0 : index
    %181 = vector.load %arg16[%c2_156, %c0_157, %c0_158] : memref<3x16x16xf32, #tpu.memory_space<vmem>>, vector<1x16x16xf32>
    %182 = vector.shape_cast %181 : vector<1x16x16xf32> to vector<16x16xf32>
    %cst_159 = arith.constant dense<0.000000e+00> : vector<16x16xf32>
    %183 = tpu.matmul %131, %182, %cst_159 {dimension_numbers = #tpu.dot_dimension_numbers<[1], [0], [0], [1], [0, 0, 1, 1], [], []>} : vector<16x16xf32>, vector<16x16xf32>, vector<16x16xf32> -> vector<16x16xf32>
    %184 = arith.addf %180, %183 : vector<16x16xf32>
    %185 = vector.broadcast %118 : vector<1x16xf32> to vector<16x16xf32>
    %186 = arith.addf %184, %185 : vector<16x16xf32>
    %187 = arith.negf %186 : vector<16x16xf32>
    %188 = math.exp %187 : vector<16x16xf32>
    %cst_160 = arith.constant 1.000000e+00 : f32
    %189 = vector.broadcast %cst_160 : f32 to vector<16x16xf32>
    %190 = arith.addf %189, %188 : vector<16x16xf32>
    %191 = arith.divf %189, %190 : vector<16x16xf32>
    %192 = arith.mulf %161, %121 : vector<16x16xf32>
    %cst_161 = arith.constant dense<0.000000e+00> : vector<16x16xf32>
    %193 = tpu.matmul %0, %192, %cst_161 {dimension_numbers = #tpu.dot_dimension_numbers<[1], [0], [0], [1], [0, 0, 1, 1], [], []>} : vector<16x16xf32>, vector<16x16xf32>, vector<16x16xf32> -> vector<16x16xf32>
    %cst_162 = arith.constant dense<0.000000e+00> : vector<16x16xf32>
    %194 = tpu.matmul %0, %193, %cst_162 {dimension_numbers = #tpu.dot_dimension_numbers<[1], [0], [0], [1], [0, 0, 1, 1], [], []>} : vector<16x16xf32>, vector<16x16xf32>, vector<16x16xf32> -> vector<16x16xf32>
    %cst_163 = arith.constant 2.000000e+00 : f32
    %195 = vector.broadcast %cst_163 : f32 to vector<16x16xf32>
    %196 = arith.mulf %195, %194 : vector<16x16xf32>
    %197 = arith.subf %196, %192 : vector<16x16xf32>
    %c0_164 = arith.constant 0 : index
    %c0_165 = arith.constant 0 : index
    %c0_166 = arith.constant 0 : index
    %198 = vector.load %arg17[%c0_164, %c0_165, %c0_166] : memref<3x16x16xf32, #tpu.memory_space<vmem>>, vector<1x16x16xf32>
    %199 = vector.shape_cast %198 : vector<1x16x16xf32> to vector<16x16xf32>
    %cst_167 = arith.constant dense<0.000000e+00> : vector<16x16xf32>
    %200 = tpu.matmul %113, %199, %cst_167 {dimension_numbers = #tpu.dot_dimension_numbers<[1], [0], [0], [1], [0, 0, 1, 1], [], []>} : vector<16x16xf32>, vector<16x16xf32>, vector<16x16xf32> -> vector<16x16xf32>
    %c0_168 = arith.constant 0 : index
    %c0_169 = arith.constant 0 : index
    %c0_170 = arith.constant 0 : index
    %201 = vector.load %arg18[%c0_168, %c0_169, %c0_170] : memref<3x16x16xf32, #tpu.memory_space<vmem>>, vector<1x16x16xf32>
    %202 = vector.shape_cast %201 : vector<1x16x16xf32> to vector<16x16xf32>
    %cst_171 = arith.constant dense<0.000000e+00> : vector<16x16xf32>
    %203 = tpu.matmul %192, %202, %cst_171 {dimension_numbers = #tpu.dot_dimension_numbers<[1], [0], [0], [1], [0, 0, 1, 1], [], []>} : vector<16x16xf32>, vector<16x16xf32>, vector<16x16xf32> -> vector<16x16xf32>
    %204 = arith.addf %200, %203 : vector<16x16xf32>
    %c1_172 = arith.constant 1 : index
    %c0_173 = arith.constant 0 : index
    %c0_174 = arith.constant 0 : index
    %205 = vector.load %arg17[%c1_172, %c0_173, %c0_174] : memref<3x16x16xf32, #tpu.memory_space<vmem>>, vector<1x16x16xf32>
    %206 = vector.shape_cast %205 : vector<1x16x16xf32> to vector<16x16xf32>
    %cst_175 = arith.constant dense<0.000000e+00> : vector<16x16xf32>
    %207 = tpu.matmul %122, %206, %cst_175 {dimension_numbers = #tpu.dot_dimension_numbers<[1], [0], [0], [1], [0, 0, 1, 1], [], []>} : vector<16x16xf32>, vector<16x16xf32>, vector<16x16xf32> -> vector<16x16xf32>
    %208 = arith.addf %204, %207 : vector<16x16xf32>
    %c1_176 = arith.constant 1 : index
    %c0_177 = arith.constant 0 : index
    %c0_178 = arith.constant 0 : index
    %209 = vector.load %arg18[%c1_176, %c0_177, %c0_178] : memref<3x16x16xf32, #tpu.memory_space<vmem>>, vector<1x16x16xf32>
    %210 = vector.shape_cast %209 : vector<1x16x16xf32> to vector<16x16xf32>
    %cst_179 = arith.constant dense<0.000000e+00> : vector<16x16xf32>
    %211 = tpu.matmul %193, %210, %cst_179 {dimension_numbers = #tpu.dot_dimension_numbers<[1], [0], [0], [1], [0, 0, 1, 1], [], []>} : vector<16x16xf32>, vector<16x16xf32>, vector<16x16xf32> -> vector<16x16xf32>
    %212 = arith.addf %208, %211 : vector<16x16xf32>
    %c2_180 = arith.constant 2 : index
    %c0_181 = arith.constant 0 : index
    %c0_182 = arith.constant 0 : index
    %213 = vector.load %arg17[%c2_180, %c0_181, %c0_182] : memref<3x16x16xf32, #tpu.memory_space<vmem>>, vector<1x16x16xf32>
    %214 = vector.shape_cast %213 : vector<1x16x16xf32> to vector<16x16xf32>
    %cst_183 = arith.constant dense<0.000000e+00> : vector<16x16xf32>
    %215 = tpu.matmul %126, %214, %cst_183 {dimension_numbers = #tpu.dot_dimension_numbers<[1], [0], [0], [1], [0, 0, 1, 1], [], []>} : vector<16x16xf32>, vector<16x16xf32>, vector<16x16xf32> -> vector<16x16xf32>
    %216 = arith.addf %212, %215 : vector<16x16xf32>
    %c2_184 = arith.constant 2 : index
    %c0_185 = arith.constant 0 : index
    %c0_186 = arith.constant 0 : index
    %217 = vector.load %arg18[%c2_184, %c0_185, %c0_186] : memref<3x16x16xf32, #tpu.memory_space<vmem>>, vector<1x16x16xf32>
    %218 = vector.shape_cast %217 : vector<1x16x16xf32> to vector<16x16xf32>
    %cst_187 = arith.constant dense<0.000000e+00> : vector<16x16xf32>
    %219 = tpu.matmul %197, %218, %cst_187 {dimension_numbers = #tpu.dot_dimension_numbers<[1], [0], [0], [1], [0, 0, 1, 1], [], []>} : vector<16x16xf32>, vector<16x16xf32>, vector<16x16xf32> -> vector<16x16xf32>
    %220 = arith.addf %216, %219 : vector<16x16xf32>
    %221 = vector.broadcast %119 : vector<1x16xf32> to vector<16x16xf32>
    %222 = arith.addf %220, %221 : vector<16x16xf32>
    %223 = math.tanh %222 : vector<16x16xf32>
    %224 = arith.mulf %191, %121 : vector<16x16xf32>
    %cst_188 = arith.constant 1.000000e+00 : f32
    %225 = vector.broadcast %cst_188 : f32 to vector<16x16xf32>
    %226 = arith.subf %225, %191 : vector<16x16xf32>
    %227 = arith.mulf %226, %223 : vector<16x16xf32>
    %228 = arith.addf %224, %227 : vector<16x16xf32>
    %c1_189 = arith.constant 1 : index
    %c0_190 = arith.constant 0 : index
    %c0_191 = arith.constant 0 : index
    %229 = vector.load %arg23[%c1_189, %c0_190, %c0_191] : memref<2x16x16xf32, #tpu.memory_space<vmem>>, vector<1x16x16xf32>
    %230 = vector.shape_cast %229 : vector<1x16x16xf32> to vector<16x16xf32>
    %231 = vector.shape_cast %228 : vector<16x16xf32> to vector<1x16x16xf32>
    tpu.vector_store %arg23[%c1_189, %c0_190, %c0_191], %231 {strides = array<i32>} : memref<2x16x16xf32, #tpu.memory_space<vmem>>, vector<1x16x16xf32>,
    %c0_192 = arith.constant 0 : index
    %c0_193 = arith.constant 0 : index
    %232 = vector.load %arg22[%c0_192, %c0_193] : memref<16x16xf32, #tpu.memory_space<vmem>>, vector<16x16xf32>
    tpu.vector_store %arg22[%c0_192, %c0_193], %228 {strides = array<i32>} : memref<16x16xf32, #tpu.memory_space<vmem>>, vector<16x16xf32>,
    return
  }
  func.func @transform_0(%arg0: i32) -> (i32, i32) {
    %c0_i32 = arith.constant 0 : i32
    %c0_i32_0 = arith.constant 0 : i32
    %c0_i32_1 = arith.constant 0 : i32
    return %c0_i32, %c0_i32_0 : i32, i32
  }
  func.func @transform_1(%arg0: i32) -> (i32, i32, i32) {
    %c0_i32 = arith.constant 0 : i32
    %c0_i32_0 = arith.constant 0 : i32
    %c0_i32_1 = arith.constant 0 : i32
    %c0_i32_2 = arith.constant 0 : i32
    return %c0_i32, %c0_i32_0, %c0_i32_1 : i32, i32, i32
  }
  func.func @transform_2(%arg0: i32) -> (i32, i32) {
    %c0_i32 = arith.constant 0 : i32
    %c0_i32_0 = arith.constant 0 : i32
    %c0_i32_1 = arith.constant 0 : i32
    return %c0_i32, %c0_i32_0 : i32, i32
  }
  func.func @transform_3(%arg0: i32) -> (i32, i32, i32) {
    %c0_i32 = arith.constant 0 : i32
    %c0_i32_0 = arith.constant 0 : i32
    %c0_i32_1 = arith.constant 0 : i32
    %c0_i32_2 = arith.constant 0 : i32
    return %c0_i32, %c0_i32_0, %c0_i32_1 : i32, i32, i32
  }
  func.func @transform_4(%arg0: i32) -> (i32, i32, i32) {
    %c0_i32 = arith.constant 0 : i32
    %c0_i32_0 = arith.constant 0 : i32
    %c0_i32_1 = arith.constant 0 : i32
    %c0_i32_2 = arith.constant 0 : i32
    return %c0_i32, %c0_i32_0, %c0_i32_1 : i32, i32, i32
  }
  func.func @transform_5(%arg0: i32) -> (i32, i32, i32) {
    %c0_i32 = arith.constant 0 : i32
    %c0_i32_0 = arith.constant 0 : i32
    %c0_i32_1 = arith.constant 0 : i32
    %c0_i32_2 = arith.constant 0 : i32
    return %c0_i32, %c0_i32_0, %c0_i32_1 : i32, i32, i32
  }
  func.func @transform_6(%arg0: i32) -> (i32, i32, i32) {
    %c0_i32 = arith.constant 0 : i32
    %c0_i32_0 = arith.constant 0 : i32
    %c0_i32_1 = arith.constant 0 : i32
    %c0_i32_2 = arith.constant 0 : i32
    return %c0_i32, %c0_i32_0, %c0_i32_1 : i32, i32, i32
  }
  func.func @transform_7(%arg0: i32) -> (i32, i32, i32) {
    %c0_i32 = arith.constant 0 : i32
    %c0_i32_0 = arith.constant 0 : i32
    %c0_i32_1 = arith.constant 0 : i32
    %c0_i32_2 = arith.constant 0 : i32
    return %c0_i32, %c0_i32_0, %c0_i32_1 : i32, i32, i32
  }
  func.func @transform_8(%arg0: i32) -> (i32, i32, i32) {
    %c0_i32 = arith.constant 0 : i32
    %c0_i32_0 = arith.constant 0 : i32
    %c0_i32_1 = arith.constant 0 : i32
    %c0_i32_2 = arith.constant 0 : i32
    return %c0_i32, %c0_i32_0, %c0_i32_1 : i32, i32, i32
  }
  func.func @transform_9(%arg0: i32) -> (i32, i32) {
    %c0_i32 = arith.constant 0 : i32
    %c0_i32_0 = arith.constant 0 : i32
    %c0_i32_1 = arith.constant 0 : i32
    return %c0_i32, %c0_i32_0 : i32, i32
  }
  func.func @transform_10(%arg0: i32) -> (i32, i32) {
    %c0_i32 = arith.constant 0 : i32
    %c0_i32_0 = arith.constant 0 : i32
    %c0_i32_1 = arith.constant 0 : i32
    return %c0_i32, %c0_i32_0 : i32, i32
  }
  func.func @transform_11(%arg0: i32) -> (i32, i32) {
    %c0_i32 = arith.constant 0 : i32
    %c0_i32_0 = arith.constant 0 : i32
    %c0_i32_1 = arith.constant 0 : i32
    return %c0_i32, %c0_i32_0 : i32, i32
  }
  func.func @transform_12(%arg0: i32) -> (i32, i32, i32) {
    %c0_i32 = arith.constant 0 : i32
    %c0_i32_0 = arith.constant 0 : i32
    %c0_i32_1 = arith.constant 0 : i32
    %c0_i32_2 = arith.constant 0 : i32
    return %c0_i32, %c0_i32_0, %c0_i32_1 : i32, i32, i32
  }
  func.func @transform_13(%arg0: i32) -> (i32, i32, i32) {
    %c0_i32 = arith.constant 0 : i32
    %c0_i32_0 = arith.constant 0 : i32
    %c0_i32_1 = arith.constant 0 : i32
    %c0_i32_2 = arith.constant 0 : i32
    return %c0_i32, %c0_i32_0, %c0_i32_1 : i32, i32, i32
  }
  func.func @transform_14(%arg0: i32) -> (i32, i32, i32) {
    %c0_i32 = arith.constant 0 : i32
    %c0_i32_0 = arith.constant 0 : i32
    %c0_i32_1 = arith.constant 0 : i32
    %c0_i32_2 = arith.constant 0 : i32
    return %c0_i32, %c0_i32_0, %c0_i32_1 : i32, i32, i32
  }
  func.func @transform_15(%arg0: i32) -> (i32, i32, i32) {
    %c0_i32 = arith.constant 0 : i32
    %c0_i32_0 = arith.constant 0 : i32
    %c0_i32_1 = arith.constant 0 : i32
    %c0_i32_2 = arith.constant 0 : i32
    return %c0_i32, %c0_i32_0, %c0_i32_1 : i32, i32, i32
  }
  func.func @transform_16(%arg0: i32) -> (i32, i32, i32) {
    %c0_i32 = arith.constant 0 : i32
    %c0_i32_0 = arith.constant 0 : i32
    %c0_i32_1 = arith.constant 0 : i32
    %c0_i32_2 = arith.constant 0 : i32
    return %c0_i32, %c0_i32_0, %c0_i32_1 : i32, i32, i32
  }
  func.func @transform_17(%arg0: i32) -> (i32, i32, i32) {
    %c0_i32 = arith.constant 0 : i32
    %c0_i32_0 = arith.constant 0 : i32
    %c0_i32_1 = arith.constant 0 : i32
    %c0_i32_2 = arith.constant 0 : i32
    return %c0_i32, %c0_i32_0, %c0_i32_1 : i32, i32, i32
  }
  func.func @transform_18(%arg0: i32) -> (i32, i32) {
    %c0_i32 = arith.constant 0 : i32
    %c0_i32_0 = arith.constant 0 : i32
    %c0_i32_1 = arith.constant 0 : i32
    return %c0_i32, %c0_i32_0 : i32, i32
  }
  func.func @transform_19(%arg0: i32) -> (i32, i32) {
    %c0_i32 = arith.constant 0 : i32
    %c0_i32_0 = arith.constant 0 : i32
    %c0_i32_1 = arith.constant 0 : i32
    return %c0_i32, %c0_i32_0 : i32, i32
  }
  func.func @transform_20(%arg0: i32) -> (i32, i32) {
    %c0_i32 = arith.constant 0 : i32
    %c0_i32_0 = arith.constant 0 : i32
    %c0_i32_1 = arith.constant 0 : i32
    return %c0_i32, %c0_i32_0 : i32, i32
  }
  func.func @transform_21(%arg0: i32) -> (i32, i32) {
    %c0_i32 = arith.constant 0 : i32
    %c0_i32_0 = arith.constant 0 : i32
    %c0_i32_1 = arith.constant 0 : i32
    return %c0_i32, %c0_i32_0 : i32, i32
  }
  func.func @transform_22(%arg0: i32) -> (i32, i32, i32) {
    %c0_i32 = arith.constant 0 : i32
    %c0_i32_0 = arith.constant 0 : i32
    %c0_i32_1 = arith.constant 0 : i32
    %c0_i32_2 = arith.constant 0 : i32
    return %c0_i32, %c0_i32_0, %c0_i32_1 : i32, i32, i32
  }
}

</mosaic_0001>

<bundles_post_ra>
// kernel: _lambda_.1
= control target key start
LH: loop header
LB: loop body
LE: loop exit
PB: predicated region body
PF: predicated region fallthrough
CT: control target
= control target key end

     0   :  { %s5990_s0 = inlined_call_operand.vmem [shape: f32[16,2], index: 0, kind: input, shape index: {}]   ;;  %s5991_s1 = inlined_call_operand.vmem [shape: f32[2,16,16], index: 1, kind: input, shape index: {}]   ;;  %s5992_s2 = inlined_call_operand.vmem [shape: f32[16,16], index: 2, kind: input, shape index: {}]   ;;  %s5993_s3 = inlined_call_operand.hbm [shape: f32[3,2,16], index: 3, kind: input, shape index: {}]   ;;  %s5994_s4 = inlined_call_operand.hbm [shape: f32[3,16,16], index: 4, kind: input, shape index: {}]   ;;  %s5995_s5 = inlined_call_operand.hbm [shape: f32[3,2,16], index: 5, kind: input, shape index: {}]   ;;  %s5996_s6 = inlined_call_operand.hbm [shape: f32[3,16,16], index: 6, kind: input, shape index: {}]   ;;  %s5997_s7 = inlined_call_operand.hbm [shape: f32[3,2,16], index: 7, kind: input, shape index: {}]   ;;  %s5998_s8 = inlined_call_operand.hbm [shape: f32[3,16,16], index: 8, kind: input, shape index: {}]   ;;  %s5999_s9 = inlined_call_operand.vmem [shape: f32[1,16], index: 9, kind: input, shape index: {}, may-alias: {9,10,18,19}]   ;;  %s6000_s10 = inlined_call_operand.vmem [shape: f32[1,16], index: 10, kind: input, shape index: {}, may-alias: {9,10,18,19}]   ;;  %s6001_s11 = inlined_call_operand.vmem [shape: f32[1,16], index: 11, kind: input, shape index: {}, may-alias: {11,20}]   ;;  %s6002_s12 = inlined_call_operand.hbm [shape: f32[3,16,16], index: 12, kind: input, shape index: {}]   ;;  %s6003_s13 = inlined_call_operand.hbm [shape: f32[3,16,16], index: 13, kind: input, shape index: {}]   ;;  %s6004_s14 = inlined_call_operand.vmem [shape: f32[3,16,16], index: 14, kind: input, shape index: {}]   ;;  %s6005_s15 = inlined_call_operand.vmem [shape: f32[3,16,16], index: 15, kind: input, shape index: {}]   ;;  %s6006_s16 = inlined_call_operand.vmem [shape: f32[3,16,16], index: 16, kind: input, shape index: {}]   ;;  %s6007_s17 = inlined_call_operand.vmem [shape: f32[3,16,16], index: 17, kind: input, shape index: {}]   ;;  %s6008_s18 = inlined_call_operand.vmem [shape: f32[1,16], index: 18, kind: input, shape index: {}, may-alias: {9,10,18,19}]   ;;  %s6009_s19 = inlined_call_operand.vmem [shape: f32[1,16], index: 19, kind: input, shape index: {}, may-alias: {9,10,18,19}]   ;;  %s6010_s20 = inlined_call_operand.vmem [shape: f32[1,16], index: 20, kind: input, shape index: {}, may-alias: {11,20}]   ;;  %s6011_s21 = inlined_call_operand.vmem [shape: f32[16,16], index: 21, kind: output, shape index: {0}]   ;;  %s6012_s22 = inlined_call_operand.vmem [shape: f32[2,16,16], index: 22, kind: output, shape index: {1}]  }
   0x1   :  { %6023 = sst [smem:[#allocation20_spill]] %s5990_s0 }
   0x2   :  { %6024 = sst [smem:[#allocation21_spill]] %s5991_s1 }
   0x3   :  { %6025 = sst [smem:[#allocation22_spill]] %s5992_s2 }
   0x4   :  { %6026 = sst [smem:[#allocation23_spill]] %s5993_s3 }
   0x5   :  { %6027 = sst [smem:[#allocation24_spill]] %s5994_s4 }
   0x6   :  { %6028 = sst [smem:[#allocation25_spill]] %s5995_s5 }
   0x7   :  { %6029 = sst [smem:[#allocation26_spill]] %s5996_s6 }
   0x8   :  { %6030 = sst [smem:[#allocation27_spill]] %s6009_s19 }
   0x9   :  { %6031 = sst [smem:[#allocation28_spill]] %s6010_s20 }
   0xa   :  { %6032 = sst [smem:[#allocation29_spill]] %s6011_s21 }
   0xb   :  { %28 = vsyncpa [#allocation3], 0 }
   0xc   :  { %29 = vsyncpa [#allocation5], 0 }
   0xd   :  { %30 = vsyncpa [#allocation8], 0 }
   0xe   :  { %31 = vsyncpa [#allocation11], 0 }
   0xf   :  { %32 = vsyncpa [#allocation14], 0  ;;  %s5331_s3 = smov [#allocation4]   ;;  %s6033_s4 = sld [smem:[#allocation24_spill]] }
  0x10   :  { %s56_s28 = sshll.u32 %s5331_s3, 4  ;;  %s57_s28 = int_to_ptr.vmem [resolvable:$true] %s56_s28 }
  0x15   :  { %s5145_s0 = scalar_lea.hbm %s6033_s4, 768 }
  0x16   :  { %p5146_p0 = scmp.ne.s32.totalorder %s6033_s4, %s5145_s0  ;;  %p5149_p1 = scmp.lt.u32.totalorder %s5145_s0, %s6033_s4 }
  0x18   :  { %p5151_p2 = pnand %p5149_p1, %p5146_p0 }
  0x1a   :  { %5154 = shalt.err (!%p5151_p2)
}
  0x1b   :  { %s5155_s6 = scalar_lea.vmem %s57_s28, 768  ;;  %p5160_p4 = scmp.lt.s32.totalorder %s57_s28, %s57_s28 }
  0x1c   :  { %p5156_p3 = scmp.ne.s32.totalorder %s57_s28, %s5155_s6  ;;  %p5161_p5 = scmp.lt.s32.totalorder %s5155_s6, %s5155_s6 }
  0x1e   :  { %p5162_p6 = por %p5161_p5, %p5160_p4 }
  0x20   :  { %p5163_p7 = pnand %p5162_p6, %p5156_p3 }
  0x22   :  { %5166 = shalt.err (!%p5163_p7)
}
  0x23   :  { %s6021_s25 = smov 128   ;;  %s5333_s26 = smov 8  }
  0x24   :  { %62 = dma.hbm_to_vmem [thread:$0]  %s6033_s4, 768, %s57_s28, [#allocation5], %s6021_s25, %s6021_s25, %s5333_s26  }
  0x25   :  { %s5334_s3 = smov [#allocation7]   ;;  %s5335_s30 = smov [#allocation10]  }
  0x26   :  { %s80_s29 = sshll.u32 %s5334_s3, 4  ;;  %s104_s0 = sshll.u32 %s5335_s30, 4  ;;  %s81_s29 = int_to_ptr.vmem [resolvable:$true] %s80_s29  ;;  %s105_s0 = int_to_ptr.vmem [resolvable:$true] %s104_s0 }
  0x27   :  { %s6034_s5 = sld [smem:[#allocation26_spill]] }
  0x2d   :  { %s5167_s24 = scalar_lea.hbm %s6034_s5, 768 }
  0x2e   :  { %p5168_p8 = scmp.ne.s32.totalorder %s6034_s5, %s5167_s24  ;;  %p5171_p9 = scmp.lt.u32.totalorder %s5167_s24, %s6034_s5 }
  0x30   :  { %p5173_p10 = pnand %p5171_p9, %p5168_p8 }
  0x32   :  { %5176 = shalt.err (!%p5173_p10)
}
  0x33   :  { %s5177_s28 = scalar_lea.vmem %s81_s29, 768  ;;  %p5182_p12 = scmp.lt.s32.totalorder %s81_s29, %s81_s29 }
  0x34   :  { %p5178_p11 = scmp.ne.s32.totalorder %s81_s29, %s5177_s28  ;;  %p5183_p13 = scmp.lt.s32.totalorder %s5177_s28, %s5177_s28 }
  0x36   :  { %p5184_p0 = por %p5183_p13, %p5182_p12 }
  0x38   :  { %p5185_p1 = pnand %p5184_p0, %p5178_p11 }
  0x3a   :  { %5188 = shalt.err (!%p5185_p1)
}
  0x3b   :  { %86 = dma.hbm_to_vmem [thread:$0]  %s6034_s5, 768, %s81_s29, [#allocation8], %s6021_s25, %s6021_s25, %s5333_s26  }
  0x3c   :  { %s5189_s20 = scalar_lea.hbm %s5998_s8, 768 }
  0x3d   :  { %p5190_p2 = scmp.ne.s32.totalorder %s5998_s8, %s5189_s20  ;;  %p5193_p3 = scmp.lt.u32.totalorder %s5189_s20, %s5998_s8 }
  0x3f   :  { %p5195_p4 = pnand %p5193_p3, %p5190_p2 }
  0x41   :  { %5198 = shalt.err (!%p5195_p4)
}
  0x42   :  { %s5199_s1 = scalar_lea.vmem %s105_s0, 768  ;;  %p5204_p6 = scmp.lt.s32.totalorder %s105_s0, %s105_s0 }
  0x43   :  { %p5200_p5 = scmp.ne.s32.totalorder %s105_s0, %s5199_s1  ;;  %p5205_p7 = scmp.lt.s32.totalorder %s5199_s1, %s5199_s1 }
  0x45   :  { %p5206_p8 = por %p5205_p7, %p5204_p6 }
  0x47   :  { %p5207_p9 = pnand %p5206_p8, %p5200_p5 }
  0x49   :  { %5210 = shalt.err (!%p5207_p9)
}
  0x4a   :  { %110 = dma.hbm_to_vmem [thread:$0]  %s5998_s8, 768, %s105_s0, [#allocation11], %s6021_s25, %s6021_s25, %s5333_s26  }
  0x4b   :  { %s5336_s24 = smov [#allocation2]   ;;  %s6035_s2 = sld [smem:[#allocation23_spill]] }
  0x4c   :  { %s44_s6 = sshll.u32 %s5336_s24, 4  ;;  %s45_s6 = int_to_ptr.vmem [resolvable:$true] %s44_s6 }
  0x51   :  { %s5211_s21 = scalar_lea.hbm %s6035_s2, 96 }
  0x52   :  { %p5212_p10 = scmp.ne.s32.totalorder %s6035_s2, %s5211_s21  ;;  %p5215_p11 = scmp.lt.u32.totalorder %s5211_s21, %s6035_s2 }
  0x54   :  { %p5217_p12 = pnand %p5215_p11, %p5212_p10 }
  0x56   :  { %5220 = shalt.err (!%p5217_p12)
}
  0x57   :  { %s5221_s30 = scalar_lea.vmem %s45_s6, 96  ;;  %p5226_p0 = scmp.lt.s32.totalorder %s45_s6, %s45_s6 }
  0x58   :  { %p5222_p13 = scmp.ne.s32.totalorder %s45_s6, %s5221_s30  ;;  %p5227_p1 = scmp.lt.s32.totalorder %s5221_s30, %s5221_s30 }
  0x5a   :  { %p5228_p2 = por %p5227_p1, %p5226_p0 }
  0x5c   :  { %p5229_p3 = pnand %p5228_p2, %p5222_p13 }
  0x5e   :  { %5232 = shalt.err (!%p5229_p3)
}
  0x5f   :  { %s5337_s8 = smov 32   ;;  %s5338_s0 = smov 2  }
  0x60   :  { %50 = dma.hbm_to_vmem [thread:$0]  %s6035_s2, 96, %s45_s6, [#allocation3], %s5337_s8, %s5337_s8, %s5338_s0  }
  0x61   :  { %s5339_s29 = smov [#allocation6]   ;;  %s5340_s24 = smov [#allocation9]  }
  0x62   :  { %s68_s5 = sshll.u32 %s5339_s29, 4  ;;  %s92_s28 = sshll.u32 %s5340_s24, 4  ;;  %s69_s5 = int_to_ptr.vmem [resolvable:$true] %s68_s5  ;;  %s5518_s28 = int_to_ptr.vmem [resolvable:$true] %s92_s28 }
  0x63   :  { %s6036_s19 = sld [smem:[#allocation25_spill]] }
  0x69   :  { %s5233_s20 = scalar_lea.hbm %s6036_s19, 96 }
  0x6a   :  { %p5234_p4 = scmp.ne.s32.totalorder %s6036_s19, %s5233_s20  ;;  %p5237_p5 = scmp.lt.u32.totalorder %s5233_s20, %s6036_s19 }
  0x6c   :  { %p5239_p6 = pnand %p5237_p5, %p5234_p4 }
  0x6e   :  { %5242 = shalt.err (!%p5239_p6)
}
  0x6f   :  { %s5243_s6 = scalar_lea.vmem %s69_s5, 96  ;;  %p5248_p8 = scmp.lt.s32.totalorder %s69_s5, %s69_s5 }
  0x70   :  { %p5244_p7 = scmp.ne.s32.totalorder %s69_s5, %s5243_s6  ;;  %p5249_p9 = scmp.lt.s32.totalorder %s5243_s6, %s5243_s6 }
  0x72   :  { %p5250_p10 = por %p5249_p9, %p5248_p8 }
  0x74   :  { %p5251_p11 = pnand %p5250_p10, %p5244_p7 }
  0x76   :  { %5254 = shalt.err (!%p5251_p11)
}
  0x77   :  { %74 = dma.hbm_to_vmem [thread:$0]  %s6036_s19, 96, %s69_s5, [#allocation5], %s5337_s8, %s5337_s8, %s5338_s0  }
  0x78   :  { %s5255_s25 = scalar_lea.hbm %s5997_s7, 96 }
  0x79   :  { %p5256_p12 = scmp.ne.s32.totalorder %s5997_s7, %s5255_s25  ;;  %p5259_p13 = scmp.lt.u32.totalorder %s5255_s25, %s5997_s7 }
  0x7b   :  { %p5261_p0 = pnand %p5259_p13, %p5256_p12 }
  0x7d   :  { %5264 = shalt.err (!%p5261_p0)
}
  0x7e   :  { %s5265_s27 = scalar_lea.vmem %s5518_s28, 96  ;;  %p5270_p2 = scmp.lt.s32.totalorder %s5518_s28, %s5518_s28 }
  0x7f   :  { %p5266_p1 = scmp.ne.s32.totalorder %s5518_s28, %s5265_s27  ;;  %p5271_p3 = scmp.lt.s32.totalorder %s5265_s27, %s5265_s27 }
  0x81   :  { %p5272_p4 = por %p5271_p3, %p5270_p2 }
  0x83   :  { %p5273_p5 = pnand %p5272_p4, %p5266_p1 }
  0x85   :  { %5276 = shalt.err (!%p5273_p5)
}
  0x86   :  { %98 = dma.hbm_to_vmem [thread:$0]  %s5997_s7, 96, %s5518_s28, [#allocation8], %s5337_s8, %s5337_s8, %s5338_s0  }
  0x87   :  { %s5341_s3 = smov [#allocation12]   ;;  %s5342_s6 = smov [#allocation13]  }
  0x88   :  { %s122_s30 = sshll.u32 %s5341_s3, 4  ;;  %s134_s2 = sshll.u32 %s5342_s6, 4  ;;  %s123_s30 = int_to_ptr.vmem [resolvable:$true] %s122_s30  ;;  %s5555_s2 = int_to_ptr.vmem [resolvable:$true] %s134_s2 }
  0x89   :  { %s5277_s29 = scalar_lea.hbm %s6002_s12, 768 }
  0x8a   :  { %p5278_p6 = scmp.ne.s32.totalorder %s6002_s12, %s5277_s29  ;;  %p5281_p7 = scmp.lt.u32.totalorder %s5277_s29, %s6002_s12 }
  0x8c   :  { %p5283_p8 = pnand %p5281_p7, %p5278_p6 }
  0x8e   :  { %5286 = shalt.err (!%p5283_p8)
}
  0x8f   :  { %s5287_s7 = scalar_lea.vmem %s123_s30, 768  ;;  %p5292_p10 = scmp.lt.s32.totalorder %s123_s30, %s123_s30 }
  0x90   :  { %p5288_p9 = scmp.ne.s32.totalorder %s123_s30, %s5287_s7  ;;  %p5293_p11 = scmp.lt.s32.totalorder %s5287_s7, %s5287_s7 }
  0x92   :  { %p5294_p12 = por %p5293_p11, %p5292_p10 }
  0x94   :  { %p5295_p13 = pnand %p5294_p12, %p5288_p9 }
  0x96   :  { %5298 = shalt.err (!%p5295_p13)
}
  0x97   :  { %s6037_s8 = smov 128   ;;  %s5299_s5 = scalar_lea.hbm %s6003_s13, 768 }
  0x98   :  { %128 = dma.hbm_to_vmem [thread:$0]  %s6002_s12, 768, %s123_s30, [#allocation11], %s6037_s8, %s6037_s8, %s5333_s26  }
  0x99   :  { %p5300_p0 = scmp.ne.s32.totalorder %s6003_s13, %s5299_s5  ;;  %p5303_p1 = scmp.lt.u32.totalorder %s5299_s5, %s6003_s13 }
  0x9b   :  { %p5305_p2 = pnand %p5303_p1, %p5300_p0 }
  0x9d   :  { %5308 = shalt.err (!%p5305_p2)
}
  0x9e   :  { %s5309_s1 = scalar_lea.vmem %s5555_s2, 768  ;;  %p5314_p4 = scmp.lt.s32.totalorder %s5555_s2, %s5555_s2 }
  0x9f   :  { %p5310_p3 = scmp.ne.s32.totalorder %s5555_s2, %s5309_s1  ;;  %p5315_p5 = scmp.lt.s32.totalorder %s5309_s1, %s5309_s1 }
  0xa1   :  { %p5316_p6 = por %p5315_p5, %p5314_p4 }
  0xa3   :  { %p5317_p7 = pnand %p5316_p6, %p5310_p3 }
  0xa5   :  { %5320 = shalt.err (!%p5317_p7)
}
  0xa6   :  { %140 = dma.hbm_to_vmem [thread:$0]  %s6003_s13, 768, %s5555_s2, [#allocation14], %s6037_s8, %s6037_s8, %s5333_s26  }
  0xa7   :  { %5321 = dma.done.wait [#allocation3], 96  }
  0xa8   :  { %5322 = vsyncadd [#allocation3], 4294967200 }
  0xa9   :  { %5323 = dma.done.wait [#allocation5], 864  }
  0xaa   :  { %5324 = vsyncadd [#allocation5], 4294966432 }
  0xab   :  { %5325 = dma.done.wait [#allocation8], 864  }
  0xac   :  { %5326 = vsyncadd [#allocation8], 4294966432 }
  0xad   :  { %5327 = dma.done.wait [#allocation11], 1536  }
  0xae   :  { %5328 = vsyncadd [#allocation11], 4294965760 }
  0xaf   :  { %5329 = dma.done.wait [#allocation14], 768  }
  0xb0   :  { %5330 = vsyncadd [#allocation14], 4294966528  ;;  %vm188_vm0 = vcmask 130048   ;;  %vm587_vm1 = vcmask 15360   ;;  %vm594_vm2 = vcmask 1041408   ;;  %s6038_s24 = sld [smem:[#allocation20_spill]] }
  0xb1   :  { %s6039_s21 = sld [smem:[#allocation22_spill]]  ;;  %v503_v4 = vld [vmem:[#allocation2] sm:$0x3]  ;;  %v674_v6 = vld [vmem:[#allocation2 + $0x2] sm:$0x3]  ;;  %s6040_s20 = sld [smem:[#allocation21_spill]] }
  0xb2   :  { %4594 = vmatprep.subr.msk.mxu0 %vm594_vm2, %v503_v4  ;;  %v762_v13 = vld [vmem:[#allocation4 + $0x10] sm:$0xff]  ;;  %v763_v14 = vld [vmem:[#allocation4 + $0x18] sm:$0xff]  ;;  %v504_v20 = vld [vmem:[#allocation4] sm:$0xff]  ;;  %s6042_s13 = sld [smem:[#allocation28_spill]]  ;;  %s6043_s8 = sld [smem:[#allocation29_spill]] }
  0xb3   :  { %4595 = vmatpush3.msk.msra.mxu0 %vm594_vm2, %v503_v4  ;;  %v4897_v15 = vpack.c.bf16 %v763_v14, %v762_v13  ;;  %v848_v16 = vld [vmem:[#allocation2 + $0x4] sm:$0x3]  ;;  %v505_v21 = vld [vmem:[#allocation4 + $0x8] sm:$0xff]  ;;  %v936_v22 = vld [vmem:[#allocation4 + $0x20] sm:$0xff] }
  0xb4   :  { %4599 = vmatprep.subr.msk.mxu0 %vm594_vm2, %v674_v6  ;;  %v937_v23 = vld [vmem:[#allocation4 + $0x28] sm:$0xff]  ;;  %v4893_v28 = vpack.c.bf16 %v505_v21, %v504_v20  ;;  %v1042_v30 = vld [vmem:[#allocation7] sm:$0xff]  ;;  %v1043_v31 = vld [vmem:[#allocation7 + $0x8] sm:$0xff] }
  0xb5   :  { %v4901_v29 = vpack.c.bf16 %v937_v23, %v936_v22  ;;  %v4905_v33 = vpack.c.bf16 %v1043_v31, %v1042_v30  ;;  %v1041_v35 = vld [vmem:[#allocation6] sm:$0x3]  ;;  %v1198_v36 = vld [vmem:[#allocation6 + $0x2] sm:$0x3]  ;;  %v1280_v37 = vld [vmem:[#allocation7 + $0x10] sm:$0xff] }
  0xb6   :  { %v5595_v0 = vld [vmem:[%s6038_s24] sm:$0xff]  ;;  %v5600_v1 = vld [vmem:[%s6038_s24 + $0x8] sm:$0xff]  ;;  %v1281_v38 = vld [vmem:[#allocation7 + $0x18] sm:$0xff]  ;;  %s6041_s24 = sld [smem:[#allocation27_spill]] }
  0xb7   :  { %v5605_v2 = vld [vmem:[%s6039_s21] sm:$0xff]  ;;  %v4877_v3 = vpack.c.bf16 %v5600_v1, %v5595_v0  ;;  %4596 = vmatprep.mubr.msk.f32.mxu0 %vm587_vm1, %v5595_v0  ;;  %v5618_v5 = vld [vmem:[%s6039_s21 + $0x8] sm:$0xff]  ;;  %v4909_v39 = vpack.c.bf16 %v1281_v38, %v1280_v37  ;;  %v1360_v40 = vld [vmem:[#allocation6 + $0x4] sm:$0x3] }
  0xb8   :  { %4563 = vmatprep.mubr.msk.f32.mxu1 %vm188_vm0, %v5605_v2  ;;  %4597 = vmatmul.mubr.msk.f32.vlgmr.msra.gmra.mrb[0].mxu0 %vm587_vm1, %v5600_v1  ;;  %v5631_v7 = vld [vmem:[%s6040_s20] sm:$0xff]  ;;  %v5636_v8 = vld [vmem:[%s6040_s20 + $0x8] sm:$0xff]  ;;  %v1698_v14 = vld [vmem:[#allocation10] sm:$0xff] }
  0xb9   :  { %4878 = vmatprep.subr.bf16.mxu1 %v4877_v3  ;;  %4600 = vmatpush3.msk.msra.mxu0 %vm594_vm2, %v674_v6  ;;  %v4885_v12 = vpack.c.bf16 %v5636_v8, %v5631_v7  ;;  %v1442_v41 = vld [vmem:[#allocation7 + $0x20] sm:$0xff]  ;;  %v1443_v42 = vld [vmem:[#allocation7 + $0x28] sm:$0xff]  ;;  %v1860_v20 = vld [vmem:[#allocation9 + $0x2] sm:$0x3] }
  0xba   :  { %4880 = vmatpush3.bf16.msra.mxu1 %v4877_v3  ;;  %4898 = vmatprep.subr.bf16.mxu0 %v4897_v15  ;;  %v4913_v43 = vpack.c.bf16 %v1443_v42, %v1442_v41  ;;  %v4260_v52 = vld [vmem:[%s5999_s9] ss:$0 sm:$0xff]  ;;  %v1942_v21 = vld [vmem:[#allocation10 + $0x10] sm:$0xff]  ;;  %v1943_v22 = vld [vmem:[#allocation10 + $0x18] sm:$0xff] }
  0xbb   :  { %v4929_v23 = vpack.c.bf16 %v1943_v22, %v1942_v21  ;;  %v5767_v37 = vld [vmem:[%s6040_s20 + $0x18] sm:$0xff]  ;;  %v3059_v38 = vld [vmem:[%s6004_s14] sm:$0xff]  ;;  %v4330_v41 = vld [vmem:[%s6004_s14 + $0x10] sm:$0xff] }
  0xbc   :  { %v4331_v42 = vld [vmem:[%s6004_s14 + $0x18] sm:$0xff]  ;;  %v4339_v21 = vld [vmem:[%s6004_s14 + $0x28] sm:$0xff] }
  0xbd   :  { %4564 = vmatmul.mubr.msk.f32.vlgmr.msra.gmra.mrb[0].mxu1 %vm188_vm0, %v5618_v5 }
  0xbe   :  { %4570 = vmatprep.mubr.msk.f32.mxu1 %vm188_vm0, %v5605_v2 }
 0x190   :  { %v5638_v9 = vpop.f32.mrb[0].mxu1 }
 0x191   :  { %v5640_v10 = vpop.f32.mrb[1].mxu1 }
 0x192   :  { %4601 = vmatprep.mubr.msk.f32.mxu0 %vm587_vm1, %v5640_v10  ;;  %v4881_v11 = vpack.c.bf16 %v5638_v9, %v5640_v10 }
 0x193   :  { %4602 = vmatmul.mubr.msk.f32.vlgmr.msra.gmra.mrb[0].mxu0 %vm587_vm1, %v5638_v9 }
 0x194   :  { %4882 = vmatprep.subr.bf16.mxu1 %v4881_v11  ;;  %4900 = vmatpush3.bf16.msra.mxu0 %v4897_v15  ;;  %v1699_v15 = vld [vmem:[#allocation10 + $0x8] sm:$0xff] }
 0x195   :  { %4884 = vmatpush3.bf16.msra.mxu1 %v4881_v11  ;;  %4611 = vmatprep.subr.msk.mxu0 %vm594_vm2, %v848_v16 }
 0x196   :  { %4886 = vmatprep.subr.bf16.mxu1 %v4885_v12 }
 0x198   :  { %4571 = vmatmul.mubr.msk.f32.vlgmr.msra.gmra.mrb[2].mxu1 %vm188_vm0, %v5618_v5 }
 0x199   :  { %4888 = vmatpush3.bf16.msra.mxu1 %v4885_v12  ;;  %4577 = vmatprep.mubr.msk.f32.mxu1 %vm188_vm0, %v5605_v2 }
 0x19c   :  { %4578 = vmatmul.mubr.msk.f32.vlgmr.msra.gmra.mrb[4].mxu1 %vm188_vm0, %v5618_v5 }
 0x19d   :  { %4584 = vmatprep.mubr.msk.f32.mxu1 %vm188_vm0, %v5605_v2 }
 0x26b   :  { %v4572_v17 = vpop.f32.mrb[2].mxu1 }
 0x26c   :  { %v336_v18 = vpop.f32.mrb[3].mxu1  ;;  %v346_v32 = vmul.f32 2.0, %v4572_v17 }
 0x26d   :  { %v345_v19 = vmul.f32 2.0, %v336_v18  ;;  %v4925_v18 = vpack.c.bf16 %v1699_v15, %v1698_v14 }
 0x26e   :  { %v5670_v34 = vsub.f32 %v346_v32, %v5600_v1 }
 0x26f   :  { %v4579_v24 = vpop.f32.mrb[4].mxu1  ;;  %v5660_v26 = vsub.f32 %v345_v19, %v5595_v0  ;;  %v1697_v19 = vld [vmem:[#allocation9] sm:$0x3] }
 0x270   :  { %v415_v25 = vpop.f32.mrb[5].mxu1 }
 0x271   :  { %v4889_v27 = vpack.c.bf16 %v4579_v24, %v415_v25  ;;  %4608 = vmatprep.mubr.msk.f32.mxu0 %vm188_vm0, %v415_v25 }
 0x272   :  { %4609 = vmatmul.mubr.msk.f32.vlgmr.msra.gmra.mrb[0].mxu0 %vm188_vm0, %v4579_v24 }
 0x273   :  { %4890 = vmatprep.subr.bf16.mxu1 %v4889_v27  ;;  %4613 = vmatprep.mubr.msk.f32.mxu0 %vm587_vm1, %v5660_v26 }
 0x274   :  { %4892 = vmatpush3.bf16.msra.mxu1 %v4889_v27  ;;  %4612 = vmatpush3.msk.msra.mxu0 %vm594_vm2, %v848_v16 }
 0x275   :  { %4894 = vmatprep.subr.bf16.mxu1 %v4893_v28  ;;  %4902 = vmatprep.subr.bf16.mxu0 %v4901_v29 }
 0x277   :  { %4585 = vmatmul.mubr.msk.f32.vlgmr.msra.gmra.mrb[6].mxu1 %vm188_vm0, %v5618_v5 }
 0x278   :  { %4896 = vmatpush3.bf16.msra.mxu1 %v4893_v28  ;;  %4591 = vmatprep.mubr.msk.f32.mxu1 %vm188_vm0, %v5631_v7 }
 0x279   :  { %4906 = vmatprep.subr.bf16.mxu1 %v4905_v33 }
 0x27a   :  { %4614 = vmatmul.mubr.msk.f32.vlgmr.msra.gmra.mrb[0].mxu0 %vm587_vm1, %v5670_v34 }
 0x27b   :  { %4592 = vmatmul.mubr.msk.f32.vlgmr.msra.gmra.mrb[8].mxu1 %vm188_vm0, %v5636_v8  ;;  %4904 = vmatpush3.bf16.msra.mxu0 %v4901_v29 }
 0x27c   :  { %4908 = vmatpush3.bf16.msra.mxu1 %v4905_v33  ;;  %4627 = vmatprep.mubr.msk.f32.mxu1 %vm188_vm0, %v5631_v7  ;;  %v3061_v33 = vld [vmem:[%s6005_s15] sm:$0xff] }
 0x27d   :  { %4630 = vmatprep.subr.msk.mxu1 %vm594_vm2, %v1041_v35 }
 0x27f   :  { %4628 = vmatmul.mubr.msk.f32.vlgmr.msra.gmra.mrb[10].mxu1 %vm188_vm0, %v5636_v8 }
 0x280   :  { %4631 = vmatpush3.msk.msra.mxu1 %vm594_vm2, %v1041_v35  ;;  %4632 = vmatprep.mubr.msk.f32.mxu1 %vm587_vm1, %v5595_v0  ;;  %v3062_v35 = vld [vmem:[%s6005_s15 + $0x8] sm:$0xff] }
 0x281   :  { %4635 = vmatprep.subr.msk.mxu1 %vm594_vm2, %v1198_v36 }
 0x287   :  { %4633 = vmatmul.mubr.msk.f32.vlgmr.msra.gmra.mrb[10].mxu1 %vm587_vm1, %v5600_v1 }
 0x288   :  { %4637 = vmatprep.mubr.msk.f32.mxu1 %vm587_vm1, %v5640_v10  ;;  %4636 = vmatpush3.msk.msra.mxu1 %vm594_vm2, %v1198_v36  ;;  %v5760_v36 = vld [vmem:[%s6040_s20 + $0x10] sm:$0xff] }
 0x289   :  { %4910 = vmatprep.subr.bf16.mxu1 %v4909_v39 }
 0x28f   :  { %4638 = vmatmul.mubr.msk.f32.vlgmr.msra.gmra.mrb[10].mxu1 %vm587_vm1, %v5638_v9 }
 0x290   :  { %4644 = vmatprep.mubr.msk.f32.mxu1 %vm188_vm0, %v415_v25  ;;  %4912 = vmatpush3.bf16.msra.mxu1 %v4909_v39  ;;  %v2111_v25 = vld [vmem:[#allocation10 + $0x28] sm:$0xff]  ;;  %v3060_v39 = vld [vmem:[%s6004_s14 + $0x8] sm:$0xff] }
 0x291   :  { %4647 = vmatprep.subr.msk.mxu1 %vm594_vm2, %v1360_v40 }
 0x297   :  { %4645 = vmatmul.mubr.msk.f32.vlgmr.msra.gmra.mrb[10].mxu1 %vm188_vm0, %v4579_v24  ;;  %v2028_v24 = vld [vmem:[#allocation9 + $0x4] sm:$0x3] }
 0x298   :  { %4649 = vmatprep.mubr.msk.f32.mxu1 %vm587_vm1, %v5660_v26  ;;  %4648 = vmatpush3.msk.msra.mxu1 %vm594_vm2, %v1360_v40  ;;  %v4981_v40 = vpack.c.bf16 %v3060_v39, %v3059_v38  ;;  %v2782_v39 = vld [vmem:[#allocation13 + $0x10] sm:$0xff] }
 0x299   :  { %4914 = vmatprep.subr.bf16.mxu1 %v4913_v43 }
 0x29f   :  { %4650 = vmatmul.mubr.msk.f32.vlgmr.msra.gmra.mrb[10].mxu1 %vm587_vm1, %v5670_v34 }
 0x2a0   :  { %4916 = vmatpush3.bf16.msra.mxu1 %v4913_v43  ;;  %v4985_v43 = vpack.c.bf16 %v4331_v42, %v4330_v41  ;;  %v2868_v42 = vld [vmem:[#allocation12 + $0x20] sm:$0xff] }
 0x34a   :  { %v4586_v44 = vpop.f32.mrb[6].mxu1 }
 0x34b   :  { %v500_v45 = vmul.f32 2.0, %v4586_v44  ;;  %v490_v46 = vpop.f32.mrb[7].mxu1  ;;  %v4278_v44 = vld [vmem:[%s6000_s10] ss:$0 sm:$0xff] }
 0x34c   :  { %v499_v47 = vmul.f32 2.0, %v490_v46 }
 0x34d   :  { %v502_v50 = vsub.f32 %v500_v45, %v5636_v8 }
 0x34e   :  { %v501_v48 = vsub.f32 %v499_v47, %v5631_v7  ;;  %v4593_v49 = vpop.f32.mrb[8].mxu1 }
 0x34f   :  { %v578_v51 = vpop.f32.mrb[9].mxu1 }
 0x350   :  { %4620 = vmatprep.mubr.msk.f32.mxu0 %vm188_vm0, %v501_v48  ;;  %4656 = vmatprep.mubr.msk.f32.mxu1 %vm188_vm0, %v501_v48 }
 0x351   :  { %4621 = vmatmul.mubr.msk.f32.vlgmr.msra.gmra.mrb[0].mxu0 %vm188_vm0, %v502_v50  ;;  %4657 = vmatmul.mubr.msk.f32.vlgmr.msra.gmra.mrb[10].mxu1 %vm188_vm0, %v502_v50 }
 0x352   :  { %4663 = vmatprep.mubr.msk.f32.mxu0 %vm188_vm0, %v5605_v2  ;;  %4670 = vmatprep.mubr.msk.f32.mxu1 %vm188_vm0, %v5605_v2 }
 0x424   :  { %v4622_v53 = vpop.f32.mrb[0].mxu0  ;;  %v5715_v54 = vpop.f32.mrb[10].mxu1 }
 0x425   :  { %v5033_v55 = vadd.f32 %v4622_v53, %v4593_v49  ;;  %v1010_v56 = vpop.f32.mrb[1].mxu0  ;;  %v5717_v57 = vpop.f32.mrb[11].mxu1  ;;  %v1528_v45 = vadd.f32 %v5715_v54, %v4278_v44  ;;  %v4300_v53 = vld [vmem:[%s6001_s11] ss:$0 sm:$0xff] }
 0x426   :  { %v5034_v58 = vadd.f32 %v1010_v56, %v578_v51  ;;  %v1527_v46 = vadd.f32 %v4278_v44, %v5717_v57 }
 0x427   :  { %v1028_v59 = vadd.f32 %v5033_v55, %v4260_v52  ;;  %v4280_v47 = vmul.f32 -1.442695, %v1528_v45  ;;  %v2954_v45 = vld [vmem:[#allocation13 + $0x20] sm:$0xff] }
 0x428   :  { %v1027_v60 = vadd.f32 %v5034_v58, %v4260_v52  ;;  %v4279_v48 = vmul.f32 -1.442695, %v1527_v46  ;;  %v2955_v46 = vld [vmem:[#allocation13 + $0x28] sm:$0xff] }
 0x429   :  { %v4262_v61 = vmul.f32 -1.442695, %v1028_v59 }
 0x42a   :  { %v4261_v62 = vmul.f32 -1.442695, %v1027_v60 }
 0x42b   :  { %5105 = vpow2.f32 %v4262_v61 }
 0x42c   :  { %5107 = vpow2.f32 %v4261_v62 }
 0x435   :  { %v5106_v63 = vpop.eup %5105 }
 0x436   :  { %v5108_v3 = vpop.eup %5107  ;;  %v1036_v4 = vadd.f32 1.0, %v5106_v63 }
 0x437   :  { %v1035_v6 = vadd.f32 1.0, %v5108_v3 }
 0x438   :  { %5109 = vrcp.f32 %v1036_v4 }
 0x439   :  { %5111 = vrcp.f32 %v1035_v6 }
 0x43a   :  { %5113 = vpow2.f32 %v4280_v47  ;;  %v4973_v47 = vpack.c.bf16 %v2955_v46, %v2954_v45 }
 0x43b   :  { %5115 = vpow2.f32 %v4279_v48  ;;  %v4342_v48 = vld [vmem:[%s6005_s15 + $0x20] sm:$0xff] }
 0x442   :  { %v5110_v11 = vpop.eup %5109 }
 0x443   :  { %v5112_v12 = vpop.eup %5111  ;;  %v1542_v13 = vmul.f32 %v5110_v11, %v5636_v8 }
 0x444   :  { %v1541_v16 = vmul.f32 %v5112_v12, %v5631_v7  ;;  %v5114_v49 = vpop.eup %5113 }
 0x445   :  { %v5116_v50 = vpop.eup %5115  ;;  %v1536_v51 = vadd.f32 1.0, %v5114_v49  ;;  %v4343_v49 = vld [vmem:[%s6005_s15 + $0x28] sm:$0xff] }
 0x446   :  { %v4917_v17 = vpack.c.bf16 %v1542_v13, %v1541_v16  ;;  %v1535_v52 = vadd.f32 1.0, %v5116_v50  ;;  %v4997_v50 = vpack.c.bf16 %v4343_v49, %v4342_v48  ;;  %v4373_v49 = vld [vmem:[%s6042_s13] ss:$0 sm:$0xff] }
 0x447   :  { %5117 = vrcp.f32 %v1536_v51 }
 0x448   :  { %4918 = vmatprep.subr.bf16.mxu0 %v4917_v17  ;;  %5119 = vrcp.f32 %v1535_v52 }
 0x449   :  { %4920 = vmatpush3.bf16.msra.mxu0 %v4917_v17  ;;  %v4334_v17 = vld [vmem:[%s6005_s15 + $0x10] sm:$0xff] }
 0x44a   :  { %4926 = vmatprep.subr.bf16.mxu0 %v4925_v18 }
 0x44c   :  { %4664 = vmatmul.mubr.msk.f32.vlgmr.msra.gmra.mrb[2].mxu0 %vm188_vm0, %v5618_v5 }
 0x44d   :  { %4928 = vmatpush3.bf16.msra.mxu0 %v4925_v18  ;;  %4677 = vmatprep.mubr.msk.f32.mxu0 %vm188_vm0, %v1541_v16  ;;  %v4335_v18 = vld [vmem:[%s6005_s15 + $0x18] sm:$0xff] }
 0x44e   :  { %4680 = vmatprep.subr.msk.mxu0 %vm594_vm2, %v1697_v19 }
 0x450   :  { %4678 = vmatmul.mubr.msk.f32.vlgmr.msra.gmra.mrb[4].mxu0 %vm188_vm0, %v1542_v13 }
 0x451   :  { %4681 = vmatpush3.msk.msra.mxu0 %vm594_vm2, %v1697_v19  ;;  %4682 = vmatprep.mubr.msk.f32.mxu0 %vm587_vm1, %v5595_v0  ;;  %v2110_v0 = vld [vmem:[#allocation10 + $0x20] sm:$0xff]  ;;  %v5118_v57 = vpop.eup %5117  ;;  %v4989_v19 = vpack.c.bf16 %v4335_v18, %v4334_v17 }
 0x452   :  { %4685 = vmatprep.subr.msk.mxu0 %vm594_vm2, %v1860_v20  ;;  %v5120_v59 = vpop.eup %5119  ;;  %v2208_v60 = vsub.f32 1.0, %v5118_v57  ;;  %v2206_v3 = vmul.f32 %v5118_v57, %v5636_v8  ;;  %v3712_v57 = vld [vmem:[%s6007_s17 + $0x8] sm:$0xff] }
 0x453   :  { %v2207_v62 = vsub.f32 1.0, %v5120_v59  ;;  %v2205_v6 = vmul.f32 %v5120_v59, %v5631_v7 }
 0x458   :  { %4683 = vmatmul.mubr.msk.f32.vlgmr.msra.gmra.mrb[4].mxu0 %vm587_vm1, %v5600_v1  ;;  %v4933_v1 = vpack.c.bf16 %v2111_v25, %v2110_v0  ;;  %v2531_v25 = vld [vmem:[#allocation13] sm:$0xff] }
 0x459   :  { %4687 = vmatprep.mubr.msk.f32.mxu0 %vm587_vm1, %v5640_v10  ;;  %4686 = vmatpush3.msk.msra.mxu0 %vm594_vm2, %v1860_v20  ;;  %v4338_v20 = vld [vmem:[%s6004_s14 + $0x20] sm:$0xff] }
 0x45a   :  { %4930 = vmatprep.subr.bf16.mxu0 %v4929_v23  ;;  %v4993_v22 = vpack.c.bf16 %v4339_v21, %v4338_v20 }
 0x460   :  { %4688 = vmatmul.mubr.msk.f32.vlgmr.msra.gmra.mrb[4].mxu0 %vm587_vm1, %v5638_v9 }
 0x461   :  { %4932 = vmatpush3.bf16.msra.mxu0 %v4929_v23 }
 0x462   :  { %4697 = vmatprep.subr.msk.mxu0 %vm594_vm2, %v2028_v24 }
 0x51f   :  { %v4665_v27 = vpop.f32.mrb[2].mxu0 }
 0x520   :  { %v1609_v28 = vpop.f32.mrb[3].mxu0 }
 0x521   :  { %v4921_v29 = vpack.c.bf16 %v4665_v27, %v1609_v28  ;;  %4694 = vmatprep.mubr.msk.f32.mxu0 %vm188_vm0, %v1609_v28 }
 0x522   :  { %4695 = vmatmul.mubr.msk.f32.vlgmr.msra.gmra.mrb[4].mxu0 %vm188_vm0, %v4665_v27  ;;  %v2532_v27 = vld [vmem:[#allocation13 + $0x8] sm:$0xff] }
 0x523   :  { %4922 = vmatprep.subr.bf16.mxu1 %v4921_v29  ;;  %4699 = vmatprep.mubr.msk.f32.mxu0 %vm587_vm1, %v5660_v26 }
 0x524   :  { %4924 = vmatpush3.bf16.msra.mxu1 %v4921_v29  ;;  %4698 = vmatpush3.msk.msra.mxu0 %vm594_vm2, %v2028_v24 }
 0x525   :  { %4934 = vmatprep.subr.bf16.mxu0 %v4933_v1 }
 0x527   :  { %4671 = vmatmul.mubr.msk.f32.vlgmr.msra.gmra.mrb[12].mxu1 %vm188_vm0, %v5618_v5 }
 0x528   :  { %4713 = vmatprep.mubr.msk.f32.mxu1 %vm188_vm0, %v5605_v2 }
 0x52a   :  { %4700 = vmatmul.mubr.msk.f32.vlgmr.msra.gmra.mrb[4].mxu0 %vm587_vm1, %v5670_v34  ;;  %v4977_v34 = vpack.c.bf16 %v3062_v35, %v3061_v33  ;;  %v2696_v33 = vld [vmem:[#allocation12 + $0x10] sm:$0xff]  ;;  %v2697_v35 = vld [vmem:[#allocation12 + $0x18] sm:$0xff] }
 0x52b   :  { %4936 = vmatpush3.bf16.msra.mxu0 %v4933_v1  ;;  %v4961_v38 = vpack.c.bf16 %v2697_v35, %v2696_v33 }
 0x52c   :  { %4978 = vmatprep.subr.bf16.mxu0 %v4977_v34 }
 0x5fa   :  { %v4672_v9 = vpop.f32.mrb[12].mxu1 }
 0x5fb   :  { %v1694_v10 = vmul.f32 2.0, %v4672_v9  ;;  %v1684_v30 = vpop.f32.mrb[13].mxu1 }
 0x5fc   :  { %v1693_v31 = vmul.f32 2.0, %v1684_v30  ;;  %v2529_v30 = vld [vmem:[#allocation12] sm:$0xff] }
 0x5fd   :  { %v1696_v26 = vsub.f32 %v1694_v10, %v1542_v13  ;;  %v4953_v10 = vpack.c.bf16 %v2532_v27, %v2531_v25  ;;  %v4358_v25 = vld [vmem:[%s6006_s16 + $0x18] sm:$0xff] }
 0x5fe   :  { %v1695_v32 = vsub.f32 %v1693_v31, %v1541_v16  ;;  %v4945_v16 = vpack.c.bf16 %v5767_v37, %v5760_v36  ;;  %v2530_v31 = vld [vmem:[#allocation12 + $0x8] sm:$0xff] }
 0x600   :  { %4706 = vmatprep.mubr.msk.f32.mxu0 %vm188_vm0, %v1695_v32 }
 0x601   :  { %4707 = vmatmul.mubr.msk.f32.vlgmr.msra.gmra.mrb[4].mxu0 %vm188_vm0, %v1696_v26  ;;  %v4957_v26 = vpack.c.bf16 %v2530_v31, %v2529_v30 }
 0x602   :  { %4980 = vmatpush3.bf16.msra.mxu0 %v4977_v34  ;;  %4783 = vmatprep.mubr.msk.f32.mxu0 %vm188_vm0, %v5760_v36 }
 0x603   :  { %4982 = vmatprep.subr.bf16.mxu0 %v4981_v40 }
 0x605   :  { %4784 = vmatmul.mubr.msk.f32.vlgmr.msra.gmra.mrb[6].mxu0 %vm188_vm0, %v5767_v37 }
 0x606   :  { %4984 = vmatpush3.bf16.msra.mxu0 %v4981_v40  ;;  %v2783_v40 = vld [vmem:[#allocation13 + $0x18] sm:$0xff] }
 0x607   :  { %4986 = vmatprep.subr.bf16.mxu0 %v4985_v43  ;;  %v4965_v41 = vpack.c.bf16 %v2783_v40, %v2782_v39 }
 0x6d4   :  { %v4708_v55 = vpop.f32.mrb[4].mxu0 }
 0x6d5   :  { %v2202_v56 = vadd.f32 %v4708_v55, %v4300_v53  ;;  %v2184_v58 = vpop.f32.mrb[5].mxu0 }
 0x6d6   :  { %v2201_v54 = vadd.f32 %v4300_v53, %v2184_v58 }
 0x6d7   :  { %5121 = vtanh.f32 %v2202_v56 }
 0x6d8   :  { %5123 = vtanh.f32 %v2201_v54  ;;  %v3711_v54 = vld [vmem:[%s6007_s17] sm:$0xff] }
 0x6d9   :  { %v5009_v59 = vpack.c.bf16 %v3712_v57, %v3711_v54 }
 0x6e1   :  { %v5122_v61 = vpop.eup %5121 }
 0x6e2   :  { %v5124_v63 = vpop.eup %5123  ;;  %v2210_v4 = vmul.f32 %v5122_v61, %v2208_v60  ;;  %v3709_v60 = vld [vmem:[%s6006_s16] sm:$0xff]  ;;  %v3710_v61 = vld [vmem:[%s6006_s16 + $0x8] sm:$0xff] }
 0x6e3   :  { %v2209_v11 = vmul.f32 %v5124_v63, %v2207_v62  ;;  %v5013_v62 = vpack.c.bf16 %v3710_v61, %v3709_v60  ;;  %v4323_v63 = vld [vmem:[%s6008_s18] ss:$0 sm:$0xff] }
 0x6e4   :  { %v5793_v12 = vadd.f32 %v2210_v4, %v2206_v3 }
 0x6e5   :  { %v5795_v13 = vadd.f32 %v2209_v11, %v2205_v6 }
 0x6e6   :  { %2214 = vst.msk [vmem:[%s6012_s22 + $0x8] sm:$0xff] %vm188_vm0, %v5793_v12 }
 0x6e7   :  { %2213 = vst.msk [vmem:[%s6012_s22] sm:$0xff] %vm188_vm0, %v5795_v13  ;;  %4790 = vmatprep.mubr.msk.f32.mxu0 %vm188_vm0, %v5795_v13  ;;  %v4937_v7 = vpack.c.bf16 %v5793_v12, %v5795_v13 }
 0x6e8   :  { %4791 = vmatmul.mubr.msk.f32.vlgmr.msra.gmra.mrb[6].mxu0 %vm188_vm0, %v5793_v12 }
 0x6e9   :  { %4938 = vmatprep.subr.bf16.mxu1 %v4937_v7  ;;  %4988 = vmatpush3.bf16.msra.mxu0 %v4985_v43  ;;  %v2869_v43 = vld [vmem:[#allocation12 + $0x28] sm:$0xff] }
 0x6ea   :  { %4940 = vmatpush3.bf16.msra.mxu1 %v4937_v7  ;;  %4990 = vmatprep.subr.bf16.mxu0 %v4989_v19  ;;  %v4969_v44 = vpack.c.bf16 %v2869_v43, %v2868_v42 }
 0x6ed   :  { %4714 = vmatmul.mubr.msk.f32.vlgmr.msra.gmra.mrb[14].mxu1 %vm188_vm0, %v5618_v5 }
 0x6ee   :  { %4720 = vmatprep.mubr.msk.f32.mxu1 %vm188_vm0, %v5605_v2 }
 0x7c0   :  { %v5817_v8 = vpop.f32.mrb[14].mxu1 }
 0x7c1   :  { %v5819_v14 = vpop.f32.mrb[15].mxu1 }
 0x7c2   :  { %4797 = vmatprep.mubr.msk.f32.mxu0 %vm188_vm0, %v5819_v14  ;;  %v4941_v15 = vpack.c.bf16 %v5817_v8, %v5819_v14 }
 0x7c3   :  { %4798 = vmatmul.mubr.msk.f32.vlgmr.msra.gmra.mrb[6].mxu0 %vm188_vm0, %v5817_v8 }
 0x7c4   :  { %4942 = vmatprep.subr.bf16.mxu1 %v4941_v15  ;;  %4992 = vmatpush3.bf16.msra.mxu0 %v4989_v19 }
 0x7c5   :  { %4944 = vmatpush3.bf16.msra.mxu1 %v4941_v15  ;;  %4994 = vmatprep.subr.bf16.mxu0 %v4993_v22 }
 0x7c6   :  { %4946 = vmatprep.subr.bf16.mxu1 %v4945_v16 }
 0x7c8   :  { %4721 = vmatmul.mubr.msk.f32.vlgmr.msra.gmra.mrb[16].mxu1 %vm188_vm0, %v5618_v5 }
 0x7c9   :  { %4948 = vmatpush3.bf16.msra.mxu1 %v4945_v16  ;;  %4727 = vmatprep.mubr.msk.f32.mxu1 %vm188_vm0, %v5605_v2 }
 0x7cc   :  { %4728 = vmatmul.mubr.msk.f32.vlgmr.msra.gmra.mrb[18].mxu1 %vm188_vm0, %v5618_v5 }
 0x7cd   :  { %4734 = vmatprep.mubr.msk.f32.mxu1 %vm188_vm0, %v5605_v2 }
 0x89b   :  { %v4722_v23 = vpop.f32.mrb[16].mxu1 }
 0x89c   :  { %v2362_v24 = vpop.f32.mrb[17].mxu1  ;;  %v2372_v32 = vmul.f32 2.0, %v4722_v23 }
 0x89d   :  { %v2371_v0 = vmul.f32 2.0, %v2362_v24 }
 0x89e   :  { %v5859_v34 = vsub.f32 %v2372_v32, %v5793_v12 }
 0x89f   :  { %v4729_v28 = vpop.f32.mrb[18].mxu1  ;;  %v5850_v1 = vsub.f32 %v2371_v0, %v5795_v13  ;;  %v4357_v0 = vld [vmem:[%s6006_s16 + $0x10] sm:$0xff] }
 0x8a0   :  { %v2441_v29 = vpop.f32.mrb[19].mxu1 }
 0x8a1   :  { %v4949_v9 = vpack.c.bf16 %v4729_v28, %v2441_v29  ;;  %4804 = vmatprep.mubr.msk.f32.mxu0 %vm188_vm0, %v2441_v29 }
 0x8a2   :  { %4805 = vmatmul.mubr.msk.f32.vlgmr.msra.gmra.mrb[6].mxu0 %vm188_vm0, %v4729_v28 }
 0x8a3   :  { %4950 = vmatprep.subr.bf16.mxu1 %v4949_v9  ;;  %4811 = vmatprep.mubr.msk.f32.mxu0 %vm188_vm0, %v5850_v1 }
 0x8a4   :  { %4952 = vmatpush3.bf16.msra.mxu1 %v4949_v9  ;;  %4996 = vmatpush3.bf16.msra.mxu0 %v4993_v22  ;;  %v4361_v9 = vld [vmem:[%s6007_s17 + $0x10] sm:$0xff] }
 0x8a5   :  { %4954 = vmatprep.subr.bf16.mxu1 %v4953_v10  ;;  %4998 = vmatprep.subr.bf16.mxu0 %v4997_v50 }
 0x8a7   :  { %4735 = vmatmul.mubr.msk.f32.vlgmr.msra.gmra.mrb[20].mxu1 %vm188_vm0, %v5618_v5 }
 0x8a8   :  { %4956 = vmatpush3.bf16.msra.mxu1 %v4953_v10  ;;  %4741 = vmatprep.mubr.msk.f32.mxu1 %vm188_vm0, %v5760_v36  ;;  %v4362_v10 = vld [vmem:[%s6007_s17 + $0x18] sm:$0xff] }
 0x8a9   :  { %4958 = vmatprep.subr.bf16.mxu1 %v4957_v26  ;;  %v5021_v30 = vpack.c.bf16 %v4362_v10, %v4361_v9 }
 0x8aa   :  { %4812 = vmatmul.mubr.msk.f32.vlgmr.msra.gmra.mrb[6].mxu0 %vm188_vm0, %v5859_v34 }
 0x8ab   :  { %4742 = vmatmul.mubr.msk.f32.vlgmr.msra.gmra.mrb[22].mxu1 %vm188_vm0, %v5767_v37  ;;  %5000 = vmatpush3.bf16.msra.mxu0 %v4997_v50 }
 0x8ac   :  { %4748 = vmatprep.mubr.msk.f32.mxu1 %vm188_vm0, %v5795_v13  ;;  %4960 = vmatpush3.bf16.msra.mxu1 %v4957_v26 }
 0x8ad   :  { %4962 = vmatprep.subr.bf16.mxu1 %v4961_v38  ;;  %5010 = vmatprep.subr.bf16.mxu0 %v5009_v59 }
 0x8b3   :  { %4749 = vmatmul.mubr.msk.f32.vlgmr.msra.gmra.mrb[22].mxu1 %vm188_vm0, %v5793_v12 }
 0x8b4   :  { %4755 = vmatprep.mubr.msk.f32.mxu1 %vm188_vm0, %v5819_v14  ;;  %4964 = vmatpush3.bf16.msra.mxu1 %v4961_v38 }
 0x8b5   :  { %4966 = vmatprep.subr.bf16.mxu1 %v4965_v41 }
 0x8bb   :  { %4756 = vmatmul.mubr.msk.f32.vlgmr.msra.gmra.mrb[22].mxu1 %vm188_vm0, %v5817_v8 }
 0x8bc   :  { %4762 = vmatprep.mubr.msk.f32.mxu1 %vm188_vm0, %v2441_v29  ;;  %4968 = vmatpush3.bf16.msra.mxu1 %v4965_v41  ;;  %v5017_v29 = vpack.c.bf16 %v4358_v25, %v4357_v0 }
 0x8bd   :  { %4970 = vmatprep.subr.bf16.mxu1 %v4969_v44 }
 0x8c3   :  { %4763 = vmatmul.mubr.msk.f32.vlgmr.msra.gmra.mrb[22].mxu1 %vm188_vm0, %v4729_v28 }
 0x8c4   :  { %4769 = vmatprep.mubr.msk.f32.mxu1 %vm188_vm0, %v5850_v1  ;;  %4972 = vmatpush3.bf16.msra.mxu1 %v4969_v44 }
 0x8c5   :  { %4974 = vmatprep.subr.bf16.mxu1 %v4973_v47 }
 0x8cb   :  { %4770 = vmatmul.mubr.msk.f32.vlgmr.msra.gmra.mrb[22].mxu1 %vm188_vm0, %v5859_v34 }
 0x8cc   :  { %4976 = vmatpush3.bf16.msra.mxu1 %v4973_v47 }
 0x97a   :  { %v4736_v51 = vpop.f32.mrb[20].mxu1 }
 0x97b   :  { %v2526_v52 = vmul.f32 2.0, %v4736_v51  ;;  %v2516_v53 = vpop.f32.mrb[21].mxu1 }
 0x97c   :  { %v2525_v55 = vmul.f32 2.0, %v2516_v53 }
 0x97d   :  { %v2528_v58 = vsub.f32 %v2526_v52, %v5767_v37 }
 0x97e   :  { %v2527_v56 = vsub.f32 %v2525_v55, %v5760_v36 }
 0x980   :  { %4776 = vmatprep.mubr.msk.f32.mxu1 %vm188_vm0, %v2527_v56  ;;  %4818 = vmatprep.mubr.msk.f32.mxu0 %vm188_vm0, %v2527_v56 }
 0x981   :  { %4777 = vmatmul.mubr.msk.f32.vlgmr.msra.gmra.mrb[22].mxu1 %vm188_vm0, %v2528_v58  ;;  %4819 = vmatmul.mubr.msk.f32.vlgmr.msra.gmra.mrb[6].mxu0 %vm188_vm0, %v2528_v58 }
 0x982   :  { %4825 = vmatprep.mubr.msk.f32.mxu1 %vm188_vm0, %v5605_v2  ;;  %5012 = vmatpush3.bf16.msra.mxu0 %v5009_v59 }
 0x983   :  { %5014 = vmatprep.subr.bf16.mxu0 %v5013_v62 }
 0xa54   :  { %v4778_v3 = vpop.f32.mrb[22].mxu1  ;;  %v5910_v4 = vpop.f32.mrb[6].mxu0 }
 0xa55   :  { %v3046_v6 = vadd.f32 %v4778_v3, %v4323_v63  ;;  %v3028_v11 = vpop.f32.mrb[23].mxu1  ;;  %v5912_v7 = vpop.f32.mrb[7].mxu0 }
 0xa56   :  { %v3045_v15 = vadd.f32 %v4323_v63, %v3028_v11 }
 0xa57   :  { %v4325_v16 = vmul.f32 -1.442695, %v3046_v6 }
 0xa58   :  { %v4324_v17 = vmul.f32 -1.442695, %v3045_v15 }
 0xa59   :  { %5125 = vpow2.f32 %v4325_v16 }
 0xa5a   :  { %5127 = vpow2.f32 %v4324_v17 }
 0xa63   :  { %v5126_v18 = vpop.eup %5125 }
 0xa64   :  { %v3054_v19 = vadd.f32 1.0, %v5126_v18  ;;  %v5128_v20 = vpop.eup %5127 }
 0xa65   :  { %v3053_v21 = vadd.f32 1.0, %v5128_v20 }
 0xa66   :  { %5129 = vrcp.f32 %v3054_v19 }
 0xa67   :  { %5131 = vrcp.f32 %v3053_v21 }
 0xa70   :  { %v5130_v22 = vpop.eup %5129 }
 0xa71   :  { %v3554_v23 = vmul.f32 %v5130_v22, %v5767_v37  ;;  %v5132_v24 = vpop.eup %5131 }
 0xa72   :  { %v3553_v27 = vmul.f32 %v5132_v24, %v5760_v36 }
 0xa74   :  { %4839 = vmatprep.mubr.msk.f32.mxu0 %vm188_vm0, %v3553_v27  ;;  %v5001_v28 = vpack.c.bf16 %v3554_v23, %v3553_v27 }
 0xa75   :  { %4840 = vmatmul.mubr.msk.f32.vlgmr.msra.gmra.mrb[8].mxu0 %vm188_vm0, %v3554_v23 }
 0xa76   :  { %5002 = vmatprep.subr.bf16.mxu1 %v5001_v28  ;;  %4846 = vmatprep.mubr.msk.f32.mxu0 %vm188_vm0, %v5795_v13  ;;  %v4365_v13 = vld [vmem:[%s6006_s16 + $0x20] sm:$0xff] }
 0xa77   :  { %5004 = vmatpush3.bf16.msra.mxu1 %v5001_v28  ;;  %5016 = vmatpush3.bf16.msra.mxu0 %v5013_v62 }
 0xa78   :  { %5018 = vmatprep.subr.bf16.mxu0 %v5017_v29 }
 0xa7a   :  { %4826 = vmatmul.mubr.msk.f32.vlgmr.msra.gmra.mrb[24].mxu1 %vm188_vm0, %v5618_v5 }
 0xa7b   :  { %4832 = vmatprep.mubr.msk.f32.mxu1 %vm188_vm0, %v5605_v2  ;;  %v4366_v2 = vld [vmem:[%s6006_s16 + $0x28] sm:$0xff] }
 0xa7c   :  { %v5025_v31 = vpack.c.bf16 %v4366_v2, %v4365_v13 }
 0xa7d   :  { %4847 = vmatmul.mubr.msk.f32.vlgmr.msra.gmra.mrb[8].mxu0 %vm188_vm0, %v5793_v12  ;;  %v4369_v12 = vld [vmem:[%s6007_s17 + $0x20] sm:$0xff] }
 0xa7e   :  { %4853 = vmatprep.mubr.msk.f32.mxu0 %vm188_vm0, %v5819_v14  ;;  %5020 = vmatpush3.bf16.msra.mxu0 %v5017_v29  ;;  %v4370_v14 = vld [vmem:[%s6007_s17 + $0x28] sm:$0xff] }
 0xa7f   :  { %5022 = vmatprep.subr.bf16.mxu0 %v5021_v30  ;;  %v5029_v33 = vpack.c.bf16 %v4370_v14, %v4369_v12 }
 0xa85   :  { %4854 = vmatmul.mubr.msk.f32.vlgmr.msra.gmra.mrb[8].mxu0 %vm188_vm0, %v5817_v8 }
 0xa86   :  { %5024 = vmatpush3.bf16.msra.mxu0 %v5021_v30 }
 0xa87   :  { %5026 = vmatprep.subr.bf16.mxu0 %v5025_v31 }
 0xb4d   :  { %v4827_v8 = vpop.f32.mrb[24].mxu1 }
 0xb4e   :  { %v3621_v32 = vpop.f32.mrb[25].mxu1 }
 0xb4f   :  { %v5005_v26 = vpack.c.bf16 %v4827_v8, %v3621_v32  ;;  %4860 = vmatprep.mubr.msk.f32.mxu0 %vm188_vm0, %v3621_v32 }
 0xb50   :  { %4861 = vmatmul.mubr.msk.f32.vlgmr.msra.gmra.mrb[8].mxu0 %vm188_vm0, %v4827_v8 }
 0xb51   :  { %5006 = vmatprep.subr.bf16.mxu1 %v5005_v26  ;;  %4867 = vmatprep.mubr.msk.f32.mxu0 %vm188_vm0, %v5850_v1  ;;  %v4346_v1 = vld [vmem:[%s6041_s24] ss:$0 sm:$0xff] }
 0xb52   :  { %5008 = vmatpush3.bf16.msra.mxu1 %v5005_v26  ;;  %5028 = vmatpush3.bf16.msra.mxu0 %v5025_v31  ;;  %v3539_v43 = vadd.f32 %v4346_v1, %v5912_v7 }
 0xb53   :  { %5030 = vmatprep.subr.bf16.mxu0 %v5029_v33 }
 0xb54   :  { %v4347_v44 = vmul.f32 -1.442695, %v3539_v43 }
 0xb55   :  { %4833 = vmatmul.mubr.msk.f32.vlgmr.msra.gmra.mrb[26].mxu1 %vm188_vm0, %v5618_v5  ;;  %v3540_v5 = vadd.f32 %v5910_v4, %v4346_v1 }
 0xb58   :  { %4868 = vmatmul.mubr.msk.f32.vlgmr.msra.gmra.mrb[8].mxu0 %vm188_vm0, %v5859_v34  ;;  %v4348_v34 = vmul.f32 -1.442695, %v3540_v5 }
 0xb59   :  { %5032 = vmatpush3.bf16.msra.mxu0 %v5029_v33 }
 0xb5a   :  { %5133 = vpow2.f32 %v4348_v34 }
 0xb5b   :  { %5135 = vpow2.f32 %v4347_v44 }
 0xb64   :  { %v5134_v45 = vpop.eup %5133 }
 0xb65   :  { %v5136_v46 = vpop.eup %5135  ;;  %v3548_v47 = vadd.f32 1.0, %v5134_v45 }
 0xb66   :  { %v3547_v48 = vadd.f32 1.0, %v5136_v46 }
 0xb67   :  { %5137 = vrcp.f32 %v3548_v47 }
 0xb68   :  { %5139 = vrcp.f32 %v3547_v48 }
 0xb71   :  { %v5138_v55 = vpop.eup %5137 }
 0xb72   :  { %v5140_v56 = vpop.eup %5139  ;;  %v4214_v58 = vsub.f32 1.0, %v5138_v55  ;;  %v4212_v60 = vmul.f32 %v5138_v55, %v5767_v37 }
 0xb73   :  { %v4213_v57 = vsub.f32 1.0, %v5140_v56  ;;  %v4211_v62 = vmul.f32 %v5140_v56, %v5760_v36 }
 0xc28   :  { %v4834_v35 = vpop.f32.mrb[26].mxu1 }
 0xc29   :  { %v3706_v38 = vmul.f32 2.0, %v4834_v35  ;;  %v3696_v39 = vpop.f32.mrb[27].mxu1 }
 0xc2a   :  { %v3705_v40 = vmul.f32 2.0, %v3696_v39 }
 0xc2b   :  { %v3708_v42 = vsub.f32 %v3706_v38, %v3554_v23 }
 0xc2c   :  { %v3707_v41 = vsub.f32 %v3705_v40, %v3553_v27 }
 0xc2e   :  { %4874 = vmatprep.mubr.msk.f32.mxu0 %vm188_vm0, %v3707_v41 }
 0xc2f   :  { %4875 = vmatmul.mubr.msk.f32.vlgmr.msra.gmra.mrb[8].mxu0 %vm188_vm0, %v3708_v42 }
 0xd02   :  { %v4876_v50 = vpop.f32.mrb[8].mxu0 }
 0xd03   :  { %v4208_v51 = vadd.f32 %v4876_v50, %v4373_v49  ;;  %v4190_v52 = vpop.f32.mrb[9].mxu0 }
 0xd04   :  { %v4207_v53 = vadd.f32 %v4373_v49, %v4190_v52 }
 0xd05   :  { %5141 = vtanh.f32 %v4208_v51 }
 0xd06   :  { %5143 = vtanh.f32 %v4207_v53 }
 0xd0f   :  { %v5142_v54 = vpop.eup %5141 }
 0xd10   :  { %v5144_v59 = vpop.eup %5143  ;;  %v4216_v61 = vmul.f32 %v5142_v54, %v4214_v58 }
 0xd11   :  { %v4215_v63 = vmul.f32 %v5144_v59, %v4213_v57 }
 0xd12   :  { %v4218_v3 = vadd.f32 %v4216_v61, %v4212_v60 }
 0xd13   :  { %v4217_v4 = vadd.f32 %v4215_v63, %v4211_v62 }
 0xd14   :  { %4375 = vst.msk [vmem:[%s6012_s22 + $0x18] sm:$0xff] %vm188_vm0, %v4218_v3  ;;  %4223 = vst.msk [vmem:[%s6043_s8 + $0x8] sm:$0xff] %vm188_vm0, %v4218_v3 }
 0xd15   :  { %4374 = vst.msk [vmem:[%s6012_s22 + $0x10] sm:$0xff] %vm188_vm0, %v4217_v4  ;;  %4222 = vst.msk [vmem:[%s6043_s8] sm:$0xff] %vm188_vm0, %v4217_v4 }
 0xd16   :  { %4232 = vsyncpa [#allocation3], 1 }
 0xd17   :  { %4233 = vsyncpa [#allocation5], 1 }
 0xd18   :  { %4234 = vsyncpa [#allocation8], 1 }
 0xd19   :  { %4235 = vsyncpa [#allocation11], 1 }
 0xd1a   :  { %4236 = vsyncpa [#allocation14], 1 }

</bundles_post_ra>
